<compile_context>
chip_gen: v7x
topology: tpu7x:2x2x1
jax: 0.10.0
libtpu: 0.0.40
codegen_flags: <defaults>
</compile_context>

<pallas_src>
import functools

import jax
import jax.numpy as jnp
import numpy as np
from jax.experimental import pallas as pl
from jax.experimental.pallas import tpu as pltpu

NCLASSES = 20
LAMBDA_CLASS = 5.0
LAMBDA_NOOBJ = 2.0
LAMBDA_OBJ = 1.0
LAMBDA_BOX = 2.0

DEFAULT_TILE_N = 32768           # cells per grid step (multiple of 1024)
_VMEM_TILE_BUDGET = 24 * 2**20   # budget for double-buffered blocks + accumulator


def _round_up(x, m):
    return ((x + m - 1) // m) * m


def _num_tensorcores():
    """2 TensorCores per chip only on v7x; v5e/v6e are single-core."""
    try:
        kind = jax.devices()[0].device_kind.lower()
    except Exception:
        return 1
    return 2 if "v7" in kind else 1


def _bce_with_logits(x, y):
    # numerically stable BCEWithLogits, elementwise (same as PyTorch)
    return jnp.maximum(x, 0.0) - x * y + jnp.log(1.0 + jnp.exp(-jnp.abs(x)))


def _yolo_partial_sums_kernel(anc_ref, r0_ref, a0_ref, pred_ref, tgt_ref,
                              out_ref, acc_ref, *,
                              n_anchors, n_classes, ss, n_valid,
                              tile_sub, tile_n, tiles_per_core):
    """Accumulates 8 per-lane partial sums over cell tiles.

    anc_ref : SMEM f32[4*A]       = [w_a..., h_a..., 1/w_a..., 1/h_a...]
    r0_ref  : SMEM i32[n_blocks]  = tile_start % (S*S)
    a0_ref  : SMEM i32[n_blocks]  = (tile_start // (S*S)) % A
    pred_ref: VMEM (5+C, tile_sub, 128)
    tgt_ref : VMEM (6,   tile_sub, 128)
    out_ref : VMEM (8, 1, 1)   (written once per core, at the last tile)
    acc_ref : VMEM (8, tile_sub, 128) f32 scratch (per-lane partial sums)
    """
    f32 = jnp.float32
    sig = jax.nn.sigmoid
    t = pl.program_id(1)

    @pl.when(t == 0)
    def _init():
        acc_ref[...] = jnp.zeros_like(acc_ref)

    blk = pl.program_id(0) * tiles_per_core + t

    # ---- exact int32 cell index (ragged-tail mask) + per-cell anchor index --------
    sub_i = jax.lax.broadcasted_iota(jnp.int32, (tile_sub, 128), 0)
    lane_i = jax.lax.broadcasted_iota(jnp.int32, (tile_sub, 128), 1)
    local = sub_i * 128 + lane_i                       # [0, tile_n)
    valid = (blk * tile_n + local) < n_valid           # masks the zero-padded tail

    # tile-local anchor math: values stay < S*S + tile_n, exact in f32
    k = (r0_ref[blk] + local).astype(f32)
    j = jnp.floor(k / float(ss))                       # S*S boundaries crossed
    a_f = a0_ref[blk].astype(f32) + j
    a_f = a_f - jnp.floor(a_f / float(n_anchors)) * float(n_anchors)

    def lookup(offset):                                # anchor value per cell
        val = jnp.zeros((tile_sub, 128), f32)
        for a in range(n_anchors):
            val = jnp.where(a_f == float(a), anc_ref[offset + a], val)
        return val

    aw = lookup(0)
    ah = lookup(n_anchors)
    inv_aw = lookup(2 * n_anchors)
    inv_ah = lookup(3 * n_anchors)

    # ---- masks ---------------------------------------------------------------------
    t_obj = tgt_ref[0].astype(f32)
    obj_m = jnp.logical_and(valid, t_obj == 1.0).astype(f32)
    noobj_m = jnp.logical_and(valid, t_obj == 0.0).astype(f32)

    # ---- objectness BCE --------------------------------------------------------------
    p_obj = pred_ref[0].astype(f32)
    bce_obj = _bce_with_logits(p_obj, t_obj)
    sig_pobj = sig(p_obj)

    # ---- decoded box preds + IoU vs target --------------------------------------------
    pred_x = pred_ref[1].astype(f32)
    pred_y = pred_ref[2].astype(f32)
    pred_w = pred_ref[3].astype(f32)
    pred_h = pred_ref[4].astype(f32)
    px = sig(pred_x)
    py = sig(pred_y)
    pw = jnp.exp(pred_w) * aw
    ph = jnp.exp(pred_h) * ah

    tx = tgt_ref[1].astype(f32)
    ty = tgt_ref[2].astype(f32)
    tw = tgt_ref[3].astype(f32)
    th = tgt_ref[4].astype(f32)

    b1x1 = px - pw * 0.5
    b1x2 = px + pw * 0.5
    b2x1 = tx - tw * 0.5
    b2x2 = tx + tw * 0.5
    ix = jnp.maximum(jnp.minimum(b1x2, b2x2) - jnp.maximum(b1x1, b2x1), 0.0)
    b1y1 = py - ph * 0.5
    b1y2 = py + ph * 0.5
    b2y1 = ty - th * 0.5
    b2y2 = ty + th * 0.5
    iy = jnp.maximum(jnp.minimum(b1y2, b2y2) - jnp.maximum(b1y1, b2y1), 0.0)

    inter = ix * iy
    area1 = (b1x2 - b1x1) * (b1y2 - b1y1)
    area2 = (b2x2 - b2x1) * (b2y2 - b2y1)
    ious = inter * pl.reciprocal(area1 + area2 - inter + 1e-6, approx=True)
    mse_obj = (sig_pobj - ious * t_obj) ** 2

    # ---- box / coordinate loss ---------------------------------------------------------
    tw_log = jnp.log(1e-16 + tw * inv_aw)
    th_log = jnp.log(1e-16 + th * inv_ah)
    box_sq = ((px - tx) ** 2 + (py - ty) ** 2 +
              (pred_w - tw_log) ** 2 + (pred_h - th_log) ** 2)

    # ---- class losses: unrolled per-class loop (no (C, ts, 128) temporaries) -----------
    t_cls = tgt_ref[5].astype(f32)
    x0 = pred_ref[5].astype(f32)
    m = x0
    true_logit = jnp.where(t_cls == 0.0, x0, 0.0)
    for cc in range(1, n_classes):
        xc = pred_ref[5 + cc].astype(f32)
        m = jnp.maximum(m, xc)
        true_logit = jnp.where(t_cls == float(cc), xc, true_logit)

    # softplus(x_c) = max(m,0) + log(exp(-max(m,0)) + exp(x_c - m) * exp(min(m,0)))
    # reusing e_c = exp(x_c - m) from the logsumexp saves C exps/cell on the EUP.
    m_pos = jnp.maximum(m, 0.0)
    base = jnp.exp(-m_pos)
    scale = jnp.exp(jnp.minimum(m, 0.0))
    sum_e = jnp.zeros((tile_sub, 128), f32)
    sum_sp = jnp.zeros((tile_sub, 128), f32)
    for cc in range(n_classes):
        e_c = jnp.exp(pred_ref[5 + cc].astype(f32) - m)
        sum_e = sum_e + e_c
        sum_sp = sum_sp + jnp.log(base + e_c * scale)

    ce = m + jnp.log(sum_e) - true_logit                        # cross-entropy
    bce_cls = float(n_classes) * m_pos + sum_sp - true_logit    # sum_c BCE(x_c, onehot_c)

    # ---- accumulate per-lane partial sums (cross-lane reduce happens once, at end) -----
    acc_ref[0] += obj_m                       # count(obj)
    acc_ref[1] += noobj_m                     # count(noobj)
    acc_ref[2] += bce_obj * noobj_m           # sum noobj BCE
    acc_ref[3] += bce_obj * obj_m             # sum obj BCE
    acc_ref[4] += mse_obj * obj_m             # sum obj MSE(sigmoid, iou*t)
    acc_ref[5] += box_sq * obj_m              # sum box squared error (4 coords)
    acc_ref[6] += ce * obj_m                  # sum cross-entropy
    acc_ref[7] += bce_cls * obj_m             # sum binary class BCE (over C)

    @pl.when(t == pl.num_programs(1) - 1)
    def _finalize():
        s_lane = jnp.sum(acc_ref[...], axis=2, keepdims=True)   # (8, ts, 1)
        out_ref[...] = jnp.sum(s_lane, axis=1, keepdims=True)   # (8, 1, 1)


def yolo_loss_pallas(predictions, target, anchors, *, tile_n=DEFAULT_TILE_N):
    """predictions: [B, A, S, S, 5+C], target: [B, A, S, S, 6], anchors: [A, 2]."""
    b, a, s1, s2, dch = predictions.shape
    c = dch - 5
    n = b * a * s1 * s2
    ss = s1 * s2
    ncores = _num_tensorcores()

    # --- tile sizing: multiple of 1024 cells => dense (8, 128) sub-blocks -------------
    bytes_per_cell = (dch + 6) * 4 * 2 + 8 * 4          # double-buffered inputs + acc
    vmem_cap_cells = max(1024, (_VMEM_TILE_BUDGET // bytes_per_cell) // 1024 * 1024)
    cap = _round_up(-(-n // ncores), 1024)
    tile_n = max(1024, min(_round_up(int(tile_n), 1024), cap, vmem_cap_cells))
    tile_sub = tile_n // 128
    tiles_per_core = -(-n // (ncores * tile_n))
    n_blocks = ncores * tiles_per_core
    n_pad = n_blocks * tile_n
    pad = n_pad - n

    # --- channel-major relayout: one fused pad+transpose+reshape ----------------------
    # TODO(synk): this is still one extra HBM read+write of the tensors; removing it
    # entirely needs allow_input_fusion or an in-kernel (tile_n, D) relayout.
    pred2d = predictions.reshape(n, dch)
    tgt2d = target.reshape(n, 6)
    if pad:
        pred2d = jnp.pad(pred2d, ((0, pad), (0, 0)))    # zeros; tail masked in-kernel
        tgt2d = jnp.pad(tgt2d, ((0, pad), (0, 0)))
    pred_cm = pred2d.T.reshape(dch, n_pad // 128, 128)
    tgt_cm = tgt2d.T.reshape(6, n_pad // 128, 128)

    # --- scalar prefetch: anchors (w, h, 1/w, 1/h) + per-tile anchor phase -------------
    anc32 = anchors.astype(jnp.float32)
    anc_flat = jnp.concatenate(
        [anc32[:, 0], anc32[:, 1], 1.0 / anc32[:, 0], 1.0 / anc32[:, 1]])
    starts = np.arange(n_blocks, dtype=np.int64) * tile_n
    tile_r0 = jnp.asarray((starts % ss).astype(np.int32))
    tile_a0 = jnp.asarray(((starts // ss) % a).astype(np.int32))

    kernel = functools.partial(
        _yolo_partial_sums_kernel,
        n_anchors=a, n_classes=c, ss=ss, n_valid=n,
        tile_sub=tile_sub, tile_n=tile_n, tiles_per_core=tiles_per_core)

    grid_spec = pltpu.PrefetchScalarGridSpec(
        num_scalar_prefetch=3,
        grid=(ncores, tiles_per_core),
        in_specs=[
            pl.BlockSpec((dch, tile_sub, 128),
                         lambda co, t, anc, r0, a0: (0, co * tiles_per_core + t, 0)),
            pl.BlockSpec((6, tile_sub, 128),
                         lambda co, t, anc, r0, a0: (0, co * tiles_per_core + t, 0)),
        ],
        out_specs=pl.BlockSpec((8, 1, 1), lambda co, t, anc, r0, a0: (co, 0, 0)),
        scratch_shapes=[pltpu.VMEM((8, tile_sub, 128), jnp.float32)],
    )

    blk_bytes = (dch + 6) * tile_sub * 128 * 4
    acc_bytes = 8 * tile_sub * 128 * 4
    vmem_limit = int(min(max(2 * (2 * blk_bytes + acc_bytes) + 8 * 2**20, 16 * 2**20),
                         44 * 2**20))

    sums = pl.pallas_call(
        kernel,
        out_shape=jax.ShapeDtypeStruct((ncores * 8, 1, 1), jnp.float32),
        grid_spec=grid_spec,
        compiler_params=pltpu.CompilerParams(
            dimension_semantics=("parallel", "arbitrary"),
            vmem_limit_bytes=vmem_limit),
    )(anc_flat, tile_r0, tile_a0, pred_cm, tgt_cm)

    # --- tiny scalar epilogue (stays in the same jit as the pallas_call) ---------------
    tot = jnp.sum(sums.reshape(ncores, 8), axis=0)
    cnt_obj, cnt_noobj = tot[0], tot[1]
    # NOTE: matches PyTorch — NaN if a batch has zero obj (or zero noobj) cells.
    no_object_loss = tot[2] / cnt_noobj
    object_loss = (tot[3] + tot[4]) / cnt_obj
    box_loss = tot[5] / (4.0 * cnt_obj)
    class_loss = tot[6] / cnt_obj
    binary_class_loss = tot[7] / (float(c) * cnt_obj)

    return (LAMBDA_BOX * box_loss
            + LAMBDA_OBJ * object_loss
            + LAMBDA_NOOBJ * no_object_loss
            + LAMBDA_CLASS * class_loss
            + LAMBDA_CLASS * binary_class_loss)


# ------------------------- pure-JAX reference (for checking) -------------------------
def yolo_loss_ref(predictions, target, anchors):
    pred = predictions.astype(jnp.float32)
    tgt = target.astype(jnp.float32)
    a = anchors.shape[0]
    anc = anchors.reshape(1, a, 1, 1, 2).astype(jnp.float32)
    obj = tgt[..., 0] == 1
    noobj = tgt[..., 0] == 0

    def masked_mean(vals, mask):
        mask = mask.astype(jnp.float32)
        return jnp.sum(vals * mask) / jnp.sum(mask)

    sig = jax.nn.sigmoid
    p0 = pred[..., 0]
    t0 = tgt[..., 0]
    no_object_loss = masked_mean(_bce_with_logits(p0, t0), noobj)
    object_loss = masked_mean(_bce_with_logits(p0, t0), obj)

    box_pred = jnp.concatenate(
        [sig(pred[..., 1:3]), jnp.exp(pred[..., 3:5]) * anc], axis=-1)
    b1, b2 = box_pred, tgt[..., 1:5]
    b1x1 = b1[..., 0] - b1[..., 2] / 2
    b1x2 = b1[..., 0] + b1[..., 2] / 2
    b2x1 = b2[..., 0] - b2[..., 2] / 2
    b2x2 = b2[..., 0] + b2[..., 2] / 2
    ix = jnp.maximum(jnp.minimum(b1x2, b2x2) - jnp.maximum(b1x1, b2x1), 0.0)
    b1y1 = b1[..., 1] - b1[..., 3] / 2
    b1y2 = b1[..., 1] + b1[..., 3] / 2
    b2y1 = b2[..., 1] - b2[..., 3] / 2
    b2y2 = b2[..., 1] + b2[..., 3] / 2
    iy = jnp.maximum(jnp.minimum(b1y2, b2y2) - jnp.maximum(b1y1, b2y1), 0.0)
    inter = ix * iy
    union = (b1x2 - b1x1) * (b1y2 - b1y1) + (b2x2 - b2x1) * (b2y2 - b2y1) - inter + 1e-6
    ious = inter / union
    object_loss = object_loss + masked_mean((sig(p0) - ious * t0) ** 2, obj)

    pred_box = jnp.concatenate([sig(pred[..., 1:3]), pred[..., 3:5]], axis=-1)
    tgt_box = jnp.concatenate(
        [tgt[..., 1:3], jnp.log(1e-16 + tgt[..., 3:5] / anc)], axis=-1)
    box_loss = masked_mean(jnp.sum((pred_box - tgt_box) ** 2, axis=-1), obj) / 4.0

    logits = pred[..., 5:]
    cls = tgt[..., 5].astype(jnp.int32)
    onehot = jax.nn.one_hot(cls, logits.shape[-1], dtype=jnp.float32)
    ce = jax.nn.logsumexp(logits, axis=-1) - jnp.sum(logits * onehot, axis=-1)
    class_loss = masked_mean(ce, obj)
    binary_class_loss = masked_mean(
        jnp.sum(_bce_with_logits(logits, onehot), axis=-1), obj) / logits.shape[-1]

    return (LAMBDA_BOX * box_loss + LAMBDA_OBJ * object_loss
            + LAMBDA_NOOBJ * no_object_loss + LAMBDA_CLASS * class_loss
            + LAMBDA_CLASS * binary_class_loss)


if __name__ == "__main__":
    B, A, S, C = 2, 3, 13, NCLASSES

    key = jax.random.PRNGKey(0)
    k_pred, k_obj, k_xy, k_wh, k_cls, k_anc = jax.random.split(key, 6)

    predictions = jax.random.normal(k_pred, (B, A, S, S, 5 + C), dtype=jnp.float32)

    obj_flag = (jax.random.uniform(k_obj, (B, A, S, S, 1)) < 0.3).astype(jnp.float32)
    xy = jax.random.uniform(k_xy, (B, A, S, S, 2), minval=0.0, maxval=1.0)
    wh = jax.random.uniform(k_wh, (B, A, S, S, 2), minval=0.1, maxval=2.0)
    cls = jax.random.randint(k_cls, (B, A, S, S, 1), 0, C).astype(jnp.float32)
    target = jnp.concatenate([obj_flag, xy, wh, cls], axis=-1)
    # make sure at least one object cell exists
    target = target.at[0, 0, 0, 0, 0].set(1.0)

    anchors = jax.random.uniform(k_anc, (A, 2), minval=0.5, maxval=2.0)

    loss = jax.block_until_ready(jax.jit(yolo_loss_pallas)(predictions, target, anchors))
    ref = jax.block_until_ready(yolo_loss_ref(predictions, target, anchors))

    np.testing.assert_allclose(np.asarray(loss), np.asarray(ref), rtol=5e-3, atol=5e-3)
    print("KERNEL_OK")
</pallas_src>

<mosaic_0001>
module attributes {stable_mosaic.version = 11 : i64} {
  func.func @_yolo_partial_sums_kernel(%arg0: i32, %arg1: i32, %arg2: memref<12xf32, #tpu.memory_space<smem>>, %arg3: memref<1xi32, #tpu.memory_space<smem>>, %arg4: memref<1xi32, #tpu.memory_space<smem>>, %arg5: memref<25x8x128xf32, #tpu.memory_space<vmem>>, %arg6: memref<6x8x128xf32, #tpu.memory_space<vmem>>, %arg7: memref<8x1x1xf32, #tpu.memory_space<vmem>>, %arg8: memref<8x8x128xf32, #tpu.memory_space<vmem>>) attributes {dimension_semantics = [#tpu.dimension_semantics<parallel>, #tpu.dimension_semantics<arbitrary>], iteration_bounds = array<i64: 1, 1>, scalar_prefetch = 3 : i64, scratch_operands = 1 : i64, tpu.core_type = #tpu.core_type<tc>, window_params = [{transform_indices = @transform_0, window_bounds = array<i64: 25, 8, 128>}, {transform_indices = @transform_1, window_bounds = array<i64: 6, 8, 128>}, {transform_indices = @transform_2, window_bounds = array<i64: 8, 1, 1>}]} {
    %c0_i32 = arith.constant 0 : i32
    %0 = arith.cmpi eq, %arg1, %c0_i32 : i32
    %1 = arith.extui %0 : i1 to i32
    %c0_i32_0 = arith.constant 0 : i32
    %2 = arith.cmpi ne, %1, %c0_i32_0 : i32
    scf.if %2 {
      %cst_257 = arith.constant 0.000000e+00 : f32
      %604 = vector.broadcast %cst_257 : f32 to vector<8x8x128xf32>
      %c0_258 = arith.constant 0 : index
      %c0_259 = arith.constant 0 : index
      %c0_260 = arith.constant 0 : index
      %605 = vector.load %arg8[%c0_258, %c0_259, %c0_260] : memref<8x8x128xf32, #tpu.memory_space<vmem>>, vector<8x8x128xf32>
      tpu.vector_store %arg8[%c0_258, %c0_259, %c0_260], %604 {strides = array<i32>} : memref<8x8x128xf32, #tpu.memory_space<vmem>>, vector<8x8x128xf32>,
    } else {
    }
    %c1_i32 = arith.constant 1 : i32
    %3 = arith.muli %arg0, %c1_i32 : i32
    %4 = arith.addi %3, %arg1 : i32
    %5 = tpu.iota {dimensions = array<i32: 0>} : vector<8x128xi32>
    %6 = tpu.iota {dimensions = array<i32: 1>} : vector<8x128xi32>
    %c128_i32 = arith.constant 128 : i32
    %7 = vector.broadcast %c128_i32 : i32 to vector<8x128xi32>
    %8 = arith.muli %5, %7 : vector<8x128xi32>
    %9 = arith.addi %8, %6 : vector<8x128xi32>
    %c1024_i32 = arith.constant 1024 : i32
    %10 = arith.muli %4, %c1024_i32 : i32
    %11 = vector.broadcast %10 : i32 to vector<8x128xi32>
    %12 = arith.addi %11, %9 : vector<8x128xi32>
    %c1014_i32 = arith.constant 1014 : i32
    %13 = vector.broadcast %c1014_i32 : i32 to vector<8x128xi32>
    %14 = arith.cmpi slt, %12, %13 : vector<8x128xi32>
    %15 = arith.index_cast %4 : i32 to index
    %16 = memref.load %arg3[%15] : memref<1xi32, #tpu.memory_space<smem>>
    %17 = vector.broadcast %16 : i32 to vector<8x128xi32>
    %18 = arith.addi %17, %9 : vector<8x128xi32>
    %19 = arith.sitofp %18 : vector<8x128xi32> to vector<8x128xf32>
    %cst = arith.constant 1.690000e+02 : f32
    %20 = vector.broadcast %cst : f32 to vector<8x128xf32>
    %21 = arith.divf %19, %20 : vector<8x128xf32>
    %22 = math.floor %21 : vector<8x128xf32>
    %23 = arith.index_cast %4 : i32 to index
    %24 = memref.load %arg4[%23] : memref<1xi32, #tpu.memory_space<smem>>
    %25 = arith.sitofp %24 : i32 to f32
    %26 = vector.broadcast %25 : f32 to vector<8x128xf32>
    %27 = arith.addf %26, %22 : vector<8x128xf32>
    %cst_1 = arith.constant 3.000000e+00 : f32
    %28 = vector.broadcast %cst_1 : f32 to vector<8x128xf32>
    %29 = arith.divf %27, %28 : vector<8x128xf32>
    %30 = math.floor %29 : vector<8x128xf32>
    %cst_2 = arith.constant 3.000000e+00 : f32
    %31 = vector.broadcast %cst_2 : f32 to vector<8x128xf32>
    %32 = arith.mulf %30, %31 : vector<8x128xf32>
    %33 = arith.subf %27, %32 : vector<8x128xf32>
    %cst_3 = arith.constant 0.000000e+00 : f32
    %34 = vector.broadcast %cst_3 : f32 to vector<8x128xf32>
    %cst_4 = arith.constant 0.000000e+00 : f32
    %35 = vector.broadcast %cst_4 : f32 to vector<8x128xf32>
    %36 = arith.cmpf oeq, %33, %35 : vector<8x128xf32>
    %c0 = arith.constant 0 : index
    %37 = memref.load %arg2[%c0] : memref<12xf32, #tpu.memory_space<smem>>
    %38 = vector.broadcast %37 : f32 to vector<8x128xf32>
    %39 = arith.select %36, %38, %34 : vector<8x128xi1>, vector<8x128xf32>
    %cst_5 = arith.constant 1.000000e+00 : f32
    %40 = vector.broadcast %cst_5 : f32 to vector<8x128xf32>
    %41 = arith.cmpf oeq, %33, %40 : vector<8x128xf32>
    %c1 = arith.constant 1 : index
    %42 = memref.load %arg2[%c1] : memref<12xf32, #tpu.memory_space<smem>>
    %43 = vector.broadcast %42 : f32 to vector<8x128xf32>
    %44 = arith.select %41, %43, %39 : vector<8x128xi1>, vector<8x128xf32>
    %cst_6 = arith.constant 2.000000e+00 : f32
    %45 = vector.broadcast %cst_6 : f32 to vector<8x128xf32>
    %46 = arith.cmpf oeq, %33, %45 : vector<8x128xf32>
    %c2 = arith.constant 2 : index
    %47 = memref.load %arg2[%c2] : memref<12xf32, #tpu.memory_space<smem>>
    %48 = vector.broadcast %47 : f32 to vector<8x128xf32>
    %49 = arith.select %46, %48, %44 : vector<8x128xi1>, vector<8x128xf32>
    %cst_7 = arith.constant 0.000000e+00 : f32
    %50 = vector.broadcast %cst_7 : f32 to vector<8x128xf32>
    %cst_8 = arith.constant 0.000000e+00 : f32
    %51 = vector.broadcast %cst_8 : f32 to vector<8x128xf32>
    %52 = arith.cmpf oeq, %33, %51 : vector<8x128xf32>
    %c3 = arith.constant 3 : index
    %53 = memref.load %arg2[%c3] : memref<12xf32, #tpu.memory_space<smem>>
    %54 = vector.broadcast %53 : f32 to vector<8x128xf32>
    %55 = arith.select %52, %54, %50 : vector<8x128xi1>, vector<8x128xf32>
    %cst_9 = arith.constant 1.000000e+00 : f32
    %56 = vector.broadcast %cst_9 : f32 to vector<8x128xf32>
    %57 = arith.cmpf oeq, %33, %56 : vector<8x128xf32>
    %c4 = arith.constant 4 : index
    %58 = memref.load %arg2[%c4] : memref<12xf32, #tpu.memory_space<smem>>
    %59 = vector.broadcast %58 : f32 to vector<8x128xf32>
    %60 = arith.select %57, %59, %55 : vector<8x128xi1>, vector<8x128xf32>
    %cst_10 = arith.constant 2.000000e+00 : f32
    %61 = vector.broadcast %cst_10 : f32 to vector<8x128xf32>
    %62 = arith.cmpf oeq, %33, %61 : vector<8x128xf32>
    %c5 = arith.constant 5 : index
    %63 = memref.load %arg2[%c5] : memref<12xf32, #tpu.memory_space<smem>>
    %64 = vector.broadcast %63 : f32 to vector<8x128xf32>
    %65 = arith.select %62, %64, %60 : vector<8x128xi1>, vector<8x128xf32>
    %cst_11 = arith.constant 0.000000e+00 : f32
    %66 = vector.broadcast %cst_11 : f32 to vector<8x128xf32>
    %cst_12 = arith.constant 0.000000e+00 : f32
    %67 = vector.broadcast %cst_12 : f32 to vector<8x128xf32>
    %68 = arith.cmpf oeq, %33, %67 : vector<8x128xf32>
    %c6 = arith.constant 6 : index
    %69 = memref.load %arg2[%c6] : memref<12xf32, #tpu.memory_space<smem>>
    %70 = vector.broadcast %69 : f32 to vector<8x128xf32>
    %71 = arith.select %68, %70, %66 : vector<8x128xi1>, vector<8x128xf32>
    %cst_13 = arith.constant 1.000000e+00 : f32
    %72 = vector.broadcast %cst_13 : f32 to vector<8x128xf32>
    %73 = arith.cmpf oeq, %33, %72 : vector<8x128xf32>
    %c7 = arith.constant 7 : index
    %74 = memref.load %arg2[%c7] : memref<12xf32, #tpu.memory_space<smem>>
    %75 = vector.broadcast %74 : f32 to vector<8x128xf32>
    %76 = arith.select %73, %75, %71 : vector<8x128xi1>, vector<8x128xf32>
    %cst_14 = arith.constant 2.000000e+00 : f32
    %77 = vector.broadcast %cst_14 : f32 to vector<8x128xf32>
    %78 = arith.cmpf oeq, %33, %77 : vector<8x128xf32>
    %c8 = arith.constant 8 : index
    %79 = memref.load %arg2[%c8] : memref<12xf32, #tpu.memory_space<smem>>
    %80 = vector.broadcast %79 : f32 to vector<8x128xf32>
    %81 = arith.select %78, %80, %76 : vector<8x128xi1>, vector<8x128xf32>
    %cst_15 = arith.constant 0.000000e+00 : f32
    %82 = vector.broadcast %cst_15 : f32 to vector<8x128xf32>
    %cst_16 = arith.constant 0.000000e+00 : f32
    %83 = vector.broadcast %cst_16 : f32 to vector<8x128xf32>
    %84 = arith.cmpf oeq, %33, %83 : vector<8x128xf32>
    %c9 = arith.constant 9 : index
    %85 = memref.load %arg2[%c9] : memref<12xf32, #tpu.memory_space<smem>>
    %86 = vector.broadcast %85 : f32 to vector<8x128xf32>
    %87 = arith.select %84, %86, %82 : vector<8x128xi1>, vector<8x128xf32>
    %cst_17 = arith.constant 1.000000e+00 : f32
    %88 = vector.broadcast %cst_17 : f32 to vector<8x128xf32>
    %89 = arith.cmpf oeq, %33, %88 : vector<8x128xf32>
    %c10 = arith.constant 10 : index
    %90 = memref.load %arg2[%c10] : memref<12xf32, #tpu.memory_space<smem>>
    %91 = vector.broadcast %90 : f32 to vector<8x128xf32>
    %92 = arith.select %89, %91, %87 : vector<8x128xi1>, vector<8x128xf32>
    %cst_18 = arith.constant 2.000000e+00 : f32
    %93 = vector.broadcast %cst_18 : f32 to vector<8x128xf32>
    %94 = arith.cmpf oeq, %33, %93 : vector<8x128xf32>
    %c11 = arith.constant 11 : index
    %95 = memref.load %arg2[%c11] : memref<12xf32, #tpu.memory_space<smem>>
    %96 = vector.broadcast %95 : f32 to vector<8x128xf32>
    %97 = arith.select %94, %96, %92 : vector<8x128xi1>, vector<8x128xf32>
    %c0_19 = arith.constant 0 : index
    %c0_20 = arith.constant 0 : index
    %c0_21 = arith.constant 0 : index
    %98 = vector.load %arg6[%c0_19, %c0_20, %c0_21] : memref<6x8x128xf32, #tpu.memory_space<vmem>>, vector<1x8x128xf32>
    %99 = vector.shape_cast %98 : vector<1x8x128xf32> to vector<8x128xf32>
    %cst_22 = arith.constant 1.000000e+00 : f32
    %100 = vector.broadcast %cst_22 : f32 to vector<8x128xf32>
    %101 = arith.cmpf oeq, %99, %100 : vector<8x128xf32>
    %102 = arith.andi %14, %101 : vector<8x128xi1>
    %103 = arith.extui %102 : vector<8x128xi1> to vector<8x128xi32>
    %104 = arith.sitofp %103 : vector<8x128xi32> to vector<8x128xf32>
    %cst_23 = arith.constant 0.000000e+00 : f32
    %105 = vector.broadcast %cst_23 : f32 to vector<8x128xf32>
    %106 = arith.cmpf oeq, %99, %105 : vector<8x128xf32>
    %107 = arith.andi %14, %106 : vector<8x128xi1>
    %108 = arith.extui %107 : vector<8x128xi1> to vector<8x128xi32>
    %109 = arith.sitofp %108 : vector<8x128xi32> to vector<8x128xf32>
    %c0_24 = arith.constant 0 : index
    %c0_25 = arith.constant 0 : index
    %c0_26 = arith.constant 0 : index
    %110 = vector.load %arg5[%c0_24, %c0_25, %c0_26] : memref<25x8x128xf32, #tpu.memory_space<vmem>>, vector<1x8x128xf32>
    %111 = vector.shape_cast %110 : vector<1x8x128xf32> to vector<8x128xf32>
    %cst_27 = arith.constant 0.000000e+00 : f32
    %112 = vector.broadcast %cst_27 : f32 to vector<8x128xf32>
    %113 = arith.maximumf %111, %112 : vector<8x128xf32>
    %114 = arith.mulf %111, %99 : vector<8x128xf32>
    %115 = arith.subf %113, %114 : vector<8x128xf32>
    %116 = math.absf %111 : vector<8x128xf32>
    %cst_28 = arith.constant 0.000000e+00 : f32
    %117 = vector.broadcast %cst_28 : f32 to vector<8x128xf32>
    %118 = arith.subf %117, %116 : vector<8x128xf32>
    %119 = math.exp %118 : vector<8x128xf32>
    %cst_29 = arith.constant 1.000000e+00 : f32
    %120 = vector.broadcast %cst_29 : f32 to vector<8x128xf32>
    %121 = arith.addf %120, %119 : vector<8x128xf32>
    %122 = math.log %121 : vector<8x128xf32>
    %123 = arith.addf %115, %122 : vector<8x128xf32>
    %124 = arith.negf %111 : vector<8x128xf32>
    %125 = math.exp %124 : vector<8x128xf32>
    %cst_30 = arith.constant 1.000000e+00 : f32
    %126 = vector.broadcast %cst_30 : f32 to vector<8x128xf32>
    %127 = arith.addf %126, %125 : vector<8x128xf32>
    %128 = arith.divf %126, %127 : vector<8x128xf32>
    %c1_31 = arith.constant 1 : index
    %c0_32 = arith.constant 0 : index
    %c0_33 = arith.constant 0 : index
    %129 = vector.load %arg5[%c1_31, %c0_32, %c0_33] : memref<25x8x128xf32, #tpu.memory_space<vmem>>, vector<1x8x128xf32>
    %130 = vector.shape_cast %129 : vector<1x8x128xf32> to vector<8x128xf32>
    %c2_34 = arith.constant 2 : index
    %c0_35 = arith.constant 0 : index
    %c0_36 = arith.constant 0 : index
    %131 = vector.load %arg5[%c2_34, %c0_35, %c0_36] : memref<25x8x128xf32, #tpu.memory_space<vmem>>, vector<1x8x128xf32>
    %132 = vector.shape_cast %131 : vector<1x8x128xf32> to vector<8x128xf32>
    %c3_37 = arith.constant 3 : index
    %c0_38 = arith.constant 0 : index
    %c0_39 = arith.constant 0 : index
    %133 = vector.load %arg5[%c3_37, %c0_38, %c0_39] : memref<25x8x128xf32, #tpu.memory_space<vmem>>, vector<1x8x128xf32>
    %134 = vector.shape_cast %133 : vector<1x8x128xf32> to vector<8x128xf32>
    %c4_40 = arith.constant 4 : index
    %c0_41 = arith.constant 0 : index
    %c0_42 = arith.constant 0 : index
    %135 = vector.load %arg5[%c4_40, %c0_41, %c0_42] : memref<25x8x128xf32, #tpu.memory_space<vmem>>, vector<1x8x128xf32>
    %136 = vector.shape_cast %135 : vector<1x8x128xf32> to vector<8x128xf32>
    %137 = arith.negf %130 : vector<8x128xf32>
    %138 = math.exp %137 : vector<8x128xf32>
    %cst_43 = arith.constant 1.000000e+00 : f32
    %139 = vector.broadcast %cst_43 : f32 to vector<8x128xf32>
    %140 = arith.addf %139, %138 : vector<8x128xf32>
    %141 = arith.divf %139, %140 : vector<8x128xf32>
    %142 = arith.negf %132 : vector<8x128xf32>
    %143 = math.exp %142 : vector<8x128xf32>
    %cst_44 = arith.constant 1.000000e+00 : f32
    %144 = vector.broadcast %cst_44 : f32 to vector<8x128xf32>
    %145 = arith.addf %144, %143 : vector<8x128xf32>
    %146 = arith.divf %144, %145 : vector<8x128xf32>
    %147 = math.exp %134 : vector<8x128xf32>
    %148 = arith.mulf %147, %49 : vector<8x128xf32>
    %149 = math.exp %136 : vector<8x128xf32>
    %150 = arith.mulf %149, %65 : vector<8x128xf32>
    %c1_45 = arith.constant 1 : index
    %c0_46 = arith.constant 0 : index
    %c0_47 = arith.constant 0 : index
    %151 = vector.load %arg6[%c1_45, %c0_46, %c0_47] : memref<6x8x128xf32, #tpu.memory_space<vmem>>, vector<1x8x128xf32>
    %152 = vector.shape_cast %151 : vector<1x8x128xf32> to vector<8x128xf32>
    %c2_48 = arith.constant 2 : index
    %c0_49 = arith.constant 0 : index
    %c0_50 = arith.constant 0 : index
    %153 = vector.load %arg6[%c2_48, %c0_49, %c0_50] : memref<6x8x128xf32, #tpu.memory_space<vmem>>, vector<1x8x128xf32>
    %154 = vector.shape_cast %153 : vector<1x8x128xf32> to vector<8x128xf32>
    %c3_51 = arith.constant 3 : index
    %c0_52 = arith.constant 0 : index
    %c0_53 = arith.constant 0 : index
    %155 = vector.load %arg6[%c3_51, %c0_52, %c0_53] : memref<6x8x128xf32, #tpu.memory_space<vmem>>, vector<1x8x128xf32>
    %156 = vector.shape_cast %155 : vector<1x8x128xf32> to vector<8x128xf32>
    %c4_54 = arith.constant 4 : index
    %c0_55 = arith.constant 0 : index
    %c0_56 = arith.constant 0 : index
    %157 = vector.load %arg6[%c4_54, %c0_55, %c0_56] : memref<6x8x128xf32, #tpu.memory_space<vmem>>, vector<1x8x128xf32>
    %158 = vector.shape_cast %157 : vector<1x8x128xf32> to vector<8x128xf32>
    %cst_57 = arith.constant 5.000000e-01 : f32
    %159 = vector.broadcast %cst_57 : f32 to vector<8x128xf32>
    %160 = arith.mulf %148, %159 : vector<8x128xf32>
    %161 = arith.subf %141, %160 : vector<8x128xf32>
    %cst_58 = arith.constant 5.000000e-01 : f32
    %162 = vector.broadcast %cst_58 : f32 to vector<8x128xf32>
    %163 = arith.mulf %148, %162 : vector<8x128xf32>
    %164 = arith.addf %141, %163 : vector<8x128xf32>
    %cst_59 = arith.constant 5.000000e-01 : f32
    %165 = vector.broadcast %cst_59 : f32 to vector<8x128xf32>
    %166 = arith.mulf %156, %165 : vector<8x128xf32>
    %167 = arith.subf %152, %166 : vector<8x128xf32>
    %cst_60 = arith.constant 5.000000e-01 : f32
    %168 = vector.broadcast %cst_60 : f32 to vector<8x128xf32>
    %169 = arith.mulf %156, %168 : vector<8x128xf32>
    %170 = arith.addf %152, %169 : vector<8x128xf32>
    %171 = arith.minimumf %164, %170 : vector<8x128xf32>
    %172 = arith.maximumf %161, %167 : vector<8x128xf32>
    %173 = arith.subf %171, %172 : vector<8x128xf32>
    %cst_61 = arith.constant 0.000000e+00 : f32
    %174 = vector.broadcast %cst_61 : f32 to vector<8x128xf32>
    %175 = arith.maximumf %173, %174 : vector<8x128xf32>
    %cst_62 = arith.constant 5.000000e-01 : f32
    %176 = vector.broadcast %cst_62 : f32 to vector<8x128xf32>
    %177 = arith.mulf %150, %176 : vector<8x128xf32>
    %178 = arith.subf %146, %177 : vector<8x128xf32>
    %cst_63 = arith.constant 5.000000e-01 : f32
    %179 = vector.broadcast %cst_63 : f32 to vector<8x128xf32>
    %180 = arith.mulf %150, %179 : vector<8x128xf32>
    %181 = arith.addf %146, %180 : vector<8x128xf32>
    %cst_64 = arith.constant 5.000000e-01 : f32
    %182 = vector.broadcast %cst_64 : f32 to vector<8x128xf32>
    %183 = arith.mulf %158, %182 : vector<8x128xf32>
    %184 = arith.subf %154, %183 : vector<8x128xf32>
    %cst_65 = arith.constant 5.000000e-01 : f32
    %185 = vector.broadcast %cst_65 : f32 to vector<8x128xf32>
    %186 = arith.mulf %158, %185 : vector<8x128xf32>
    %187 = arith.addf %154, %186 : vector<8x128xf32>
    %188 = arith.minimumf %181, %187 : vector<8x128xf32>
    %189 = arith.maximumf %178, %184 : vector<8x128xf32>
    %190 = arith.subf %188, %189 : vector<8x128xf32>
    %cst_66 = arith.constant 0.000000e+00 : f32
    %191 = vector.broadcast %cst_66 : f32 to vector<8x128xf32>
    %192 = arith.maximumf %190, %191 : vector<8x128xf32>
    %193 = arith.mulf %175, %192 : vector<8x128xf32>
    %194 = arith.subf %164, %161 : vector<8x128xf32>
    %195 = arith.subf %181, %178 : vector<8x128xf32>
    %196 = arith.mulf %194, %195 : vector<8x128xf32>
    %197 = arith.subf %170, %167 : vector<8x128xf32>
    %198 = arith.subf %187, %184 : vector<8x128xf32>
    %199 = arith.mulf %197, %198 : vector<8x128xf32>
    %200 = arith.addf %196, %199 : vector<8x128xf32>
    %201 = arith.subf %200, %193 : vector<8x128xf32>
    %cst_67 = arith.constant 9.99999997E-7 : f32
    %202 = vector.broadcast %cst_67 : f32 to vector<8x128xf32>
    %203 = arith.addf %201, %202 : vector<8x128xf32>
    %204 = tpu.reciprocal %203 {approx = true} : vector<8x128xf32> -> vector<8x128xf32>
    %205 = arith.mulf %193, %204 : vector<8x128xf32>
    %206 = arith.mulf %205, %99 : vector<8x128xf32>
    %207 = arith.subf %128, %206 : vector<8x128xf32>
    %208 = arith.mulf %207, %207 : vector<8x128xf32>
    %209 = arith.mulf %156, %81 : vector<8x128xf32>
    %cst_68 = arith.constant 1.000000e-16 : f32
    %210 = vector.broadcast %cst_68 : f32 to vector<8x128xf32>
    %211 = arith.addf %210, %209 : vector<8x128xf32>
    %212 = math.log %211 : vector<8x128xf32>
    %213 = arith.mulf %158, %97 : vector<8x128xf32>
    %cst_69 = arith.constant 1.000000e-16 : f32
    %214 = vector.broadcast %cst_69 : f32 to vector<8x128xf32>
    %215 = arith.addf %214, %213 : vector<8x128xf32>
    %216 = math.log %215 : vector<8x128xf32>
    %217 = arith.subf %141, %152 : vector<8x128xf32>
    %218 = arith.mulf %217, %217 : vector<8x128xf32>
    %219 = arith.subf %146, %154 : vector<8x128xf32>
    %220 = arith.mulf %219, %219 : vector<8x128xf32>
    %221 = arith.addf %218, %220 : vector<8x128xf32>
    %222 = arith.subf %134, %212 : vector<8x128xf32>
    %223 = arith.mulf %222, %222 : vector<8x128xf32>
    %224 = arith.addf %221, %223 : vector<8x128xf32>
    %225 = arith.subf %136, %216 : vector<8x128xf32>
    %226 = arith.mulf %225, %225 : vector<8x128xf32>
    %227 = arith.addf %224, %226 : vector<8x128xf32>
    %c5_70 = arith.constant 5 : index
    %c0_71 = arith.constant 0 : index
    %c0_72 = arith.constant 0 : index
    %228 = vector.load %arg6[%c5_70, %c0_71, %c0_72] : memref<6x8x128xf32, #tpu.memory_space<vmem>>, vector<1x8x128xf32>
    %229 = vector.shape_cast %228 : vector<1x8x128xf32> to vector<8x128xf32>
    %c5_73 = arith.constant 5 : index
    %c0_74 = arith.constant 0 : index
    %c0_75 = arith.constant 0 : index
    %230 = vector.load %arg5[%c5_73, %c0_74, %c0_75] : memref<25x8x128xf32, #tpu.memory_space<vmem>>, vector<1x8x128xf32>
    %231 = vector.shape_cast %230 : vector<1x8x128xf32> to vector<8x128xf32>
    %cst_76 = arith.constant 0.000000e+00 : f32
    %232 = vector.broadcast %cst_76 : f32 to vector<8x128xf32>
    %233 = arith.cmpf oeq, %229, %232 : vector<8x128xf32>
    %cst_77 = arith.constant 0.000000e+00 : f32
    %234 = vector.broadcast %cst_77 : f32 to vector<8x128xf32>
    %235 = arith.select %233, %231, %234 : vector<8x128xi1>, vector<8x128xf32>
    %c6_78 = arith.constant 6 : index
    %c0_79 = arith.constant 0 : index
    %c0_80 = arith.constant 0 : index
    %236 = vector.load %arg5[%c6_78, %c0_79, %c0_80] : memref<25x8x128xf32, #tpu.memory_space<vmem>>, vector<1x8x128xf32>
    %237 = vector.shape_cast %236 : vector<1x8x128xf32> to vector<8x128xf32>
    %238 = arith.maximumf %231, %237 : vector<8x128xf32>
    %cst_81 = arith.constant 1.000000e+00 : f32
    %239 = vector.broadcast %cst_81 : f32 to vector<8x128xf32>
    %240 = arith.cmpf oeq, %229, %239 : vector<8x128xf32>
    %241 = arith.select %240, %237, %235 : vector<8x128xi1>, vector<8x128xf32>
    %c7_82 = arith.constant 7 : index
    %c0_83 = arith.constant 0 : index
    %c0_84 = arith.constant 0 : index
    %242 = vector.load %arg5[%c7_82, %c0_83, %c0_84] : memref<25x8x128xf32, #tpu.memory_space<vmem>>, vector<1x8x128xf32>
    %243 = vector.shape_cast %242 : vector<1x8x128xf32> to vector<8x128xf32>
    %244 = arith.maximumf %238, %243 : vector<8x128xf32>
    %cst_85 = arith.constant 2.000000e+00 : f32
    %245 = vector.broadcast %cst_85 : f32 to vector<8x128xf32>
    %246 = arith.cmpf oeq, %229, %245 : vector<8x128xf32>
    %247 = arith.select %246, %243, %241 : vector<8x128xi1>, vector<8x128xf32>
    %c8_86 = arith.constant 8 : index
    %c0_87 = arith.constant 0 : index
    %c0_88 = arith.constant 0 : index
    %248 = vector.load %arg5[%c8_86, %c0_87, %c0_88] : memref<25x8x128xf32, #tpu.memory_space<vmem>>, vector<1x8x128xf32>
    %249 = vector.shape_cast %248 : vector<1x8x128xf32> to vector<8x128xf32>
    %250 = arith.maximumf %244, %249 : vector<8x128xf32>
    %cst_89 = arith.constant 3.000000e+00 : f32
    %251 = vector.broadcast %cst_89 : f32 to vector<8x128xf32>
    %252 = arith.cmpf oeq, %229, %251 : vector<8x128xf32>
    %253 = arith.select %252, %249, %247 : vector<8x128xi1>, vector<8x128xf32>
    %c9_90 = arith.constant 9 : index
    %c0_91 = arith.constant 0 : index
    %c0_92 = arith.constant 0 : index
    %254 = vector.load %arg5[%c9_90, %c0_91, %c0_92] : memref<25x8x128xf32, #tpu.memory_space<vmem>>, vector<1x8x128xf32>
    %255 = vector.shape_cast %254 : vector<1x8x128xf32> to vector<8x128xf32>
    %256 = arith.maximumf %250, %255 : vector<8x128xf32>
    %cst_93 = arith.constant 4.000000e+00 : f32
    %257 = vector.broadcast %cst_93 : f32 to vector<8x128xf32>
    %258 = arith.cmpf oeq, %229, %257 : vector<8x128xf32>
    %259 = arith.select %258, %255, %253 : vector<8x128xi1>, vector<8x128xf32>
    %c10_94 = arith.constant 10 : index
    %c0_95 = arith.constant 0 : index
    %c0_96 = arith.constant 0 : index
    %260 = vector.load %arg5[%c10_94, %c0_95, %c0_96] : memref<25x8x128xf32, #tpu.memory_space<vmem>>, vector<1x8x128xf32>
    %261 = vector.shape_cast %260 : vector<1x8x128xf32> to vector<8x128xf32>
    %262 = arith.maximumf %256, %261 : vector<8x128xf32>
    %cst_97 = arith.constant 5.000000e+00 : f32
    %263 = vector.broadcast %cst_97 : f32 to vector<8x128xf32>
    %264 = arith.cmpf oeq, %229, %263 : vector<8x128xf32>
    %265 = arith.select %264, %261, %259 : vector<8x128xi1>, vector<8x128xf32>
    %c11_98 = arith.constant 11 : index
    %c0_99 = arith.constant 0 : index
    %c0_100 = arith.constant 0 : index
    %266 = vector.load %arg5[%c11_98, %c0_99, %c0_100] : memref<25x8x128xf32, #tpu.memory_space<vmem>>, vector<1x8x128xf32>
    %267 = vector.shape_cast %266 : vector<1x8x128xf32> to vector<8x128xf32>
    %268 = arith.maximumf %262, %267 : vector<8x128xf32>
    %cst_101 = arith.constant 6.000000e+00 : f32
    %269 = vector.broadcast %cst_101 : f32 to vector<8x128xf32>
    %270 = arith.cmpf oeq, %229, %269 : vector<8x128xf32>
    %271 = arith.select %270, %267, %265 : vector<8x128xi1>, vector<8x128xf32>
    %c12 = arith.constant 12 : index
    %c0_102 = arith.constant 0 : index
    %c0_103 = arith.constant 0 : index
    %272 = vector.load %arg5[%c12, %c0_102, %c0_103] : memref<25x8x128xf32, #tpu.memory_space<vmem>>, vector<1x8x128xf32>
    %273 = vector.shape_cast %272 : vector<1x8x128xf32> to vector<8x128xf32>
    %274 = arith.maximumf %268, %273 : vector<8x128xf32>
    %cst_104 = arith.constant 7.000000e+00 : f32
    %275 = vector.broadcast %cst_104 : f32 to vector<8x128xf32>
    %276 = arith.cmpf oeq, %229, %275 : vector<8x128xf32>
    %277 = arith.select %276, %273, %271 : vector<8x128xi1>, vector<8x128xf32>
    %c13 = arith.constant 13 : index
    %c0_105 = arith.constant 0 : index
    %c0_106 = arith.constant 0 : index
    %278 = vector.load %arg5[%c13, %c0_105, %c0_106] : memref<25x8x128xf32, #tpu.memory_space<vmem>>, vector<1x8x128xf32>
    %279 = vector.shape_cast %278 : vector<1x8x128xf32> to vector<8x128xf32>
    %280 = arith.maximumf %274, %279 : vector<8x128xf32>
    %cst_107 = arith.constant 8.000000e+00 : f32
    %281 = vector.broadcast %cst_107 : f32 to vector<8x128xf32>
    %282 = arith.cmpf oeq, %229, %281 : vector<8x128xf32>
    %283 = arith.select %282, %279, %277 : vector<8x128xi1>, vector<8x128xf32>
    %c14 = arith.constant 14 : index
    %c0_108 = arith.constant 0 : index
    %c0_109 = arith.constant 0 : index
    %284 = vector.load %arg5[%c14, %c0_108, %c0_109] : memref<25x8x128xf32, #tpu.memory_space<vmem>>, vector<1x8x128xf32>
    %285 = vector.shape_cast %284 : vector<1x8x128xf32> to vector<8x128xf32>
    %286 = arith.maximumf %280, %285 : vector<8x128xf32>
    %cst_110 = arith.constant 9.000000e+00 : f32
    %287 = vector.broadcast %cst_110 : f32 to vector<8x128xf32>
    %288 = arith.cmpf oeq, %229, %287 : vector<8x128xf32>
    %289 = arith.select %288, %285, %283 : vector<8x128xi1>, vector<8x128xf32>
    %c15 = arith.constant 15 : index
    %c0_111 = arith.constant 0 : index
    %c0_112 = arith.constant 0 : index
    %290 = vector.load %arg5[%c15, %c0_111, %c0_112] : memref<25x8x128xf32, #tpu.memory_space<vmem>>, vector<1x8x128xf32>
    %291 = vector.shape_cast %290 : vector<1x8x128xf32> to vector<8x128xf32>
    %292 = arith.maximumf %286, %291 : vector<8x128xf32>
    %cst_113 = arith.constant 1.000000e+01 : f32
    %293 = vector.broadcast %cst_113 : f32 to vector<8x128xf32>
    %294 = arith.cmpf oeq, %229, %293 : vector<8x128xf32>
    %295 = arith.select %294, %291, %289 : vector<8x128xi1>, vector<8x128xf32>
    %c16 = arith.constant 16 : index
    %c0_114 = arith.constant 0 : index
    %c0_115 = arith.constant 0 : index
    %296 = vector.load %arg5[%c16, %c0_114, %c0_115] : memref<25x8x128xf32, #tpu.memory_space<vmem>>, vector<1x8x128xf32>
    %297 = vector.shape_cast %296 : vector<1x8x128xf32> to vector<8x128xf32>
    %298 = arith.maximumf %292, %297 : vector<8x128xf32>
    %cst_116 = arith.constant 1.100000e+01 : f32
    %299 = vector.broadcast %cst_116 : f32 to vector<8x128xf32>
    %300 = arith.cmpf oeq, %229, %299 : vector<8x128xf32>
    %301 = arith.select %300, %297, %295 : vector<8x128xi1>, vector<8x128xf32>
    %c17 = arith.constant 17 : index
    %c0_117 = arith.constant 0 : index
    %c0_118 = arith.constant 0 : index
    %302 = vector.load %arg5[%c17, %c0_117, %c0_118] : memref<25x8x128xf32, #tpu.memory_space<vmem>>, vector<1x8x128xf32>
    %303 = vector.shape_cast %302 : vector<1x8x128xf32> to vector<8x128xf32>
    %304 = arith.maximumf %298, %303 : vector<8x128xf32>
    %cst_119 = arith.constant 1.200000e+01 : f32
    %305 = vector.broadcast %cst_119 : f32 to vector<8x128xf32>
    %306 = arith.cmpf oeq, %229, %305 : vector<8x128xf32>
    %307 = arith.select %306, %303, %301 : vector<8x128xi1>, vector<8x128xf32>
    %c18 = arith.constant 18 : index
    %c0_120 = arith.constant 0 : index
    %c0_121 = arith.constant 0 : index
    %308 = vector.load %arg5[%c18, %c0_120, %c0_121] : memref<25x8x128xf32, #tpu.memory_space<vmem>>, vector<1x8x128xf32>
    %309 = vector.shape_cast %308 : vector<1x8x128xf32> to vector<8x128xf32>
    %310 = arith.maximumf %304, %309 : vector<8x128xf32>
    %cst_122 = arith.constant 1.300000e+01 : f32
    %311 = vector.broadcast %cst_122 : f32 to vector<8x128xf32>
    %312 = arith.cmpf oeq, %229, %311 : vector<8x128xf32>
    %313 = arith.select %312, %309, %307 : vector<8x128xi1>, vector<8x128xf32>
    %c19 = arith.constant 19 : index
    %c0_123 = arith.constant 0 : index
    %c0_124 = arith.constant 0 : index
    %314 = vector.load %arg5[%c19, %c0_123, %c0_124] : memref<25x8x128xf32, #tpu.memory_space<vmem>>, vector<1x8x128xf32>
    %315 = vector.shape_cast %314 : vector<1x8x128xf32> to vector<8x128xf32>
    %316 = arith.maximumf %310, %315 : vector<8x128xf32>
    %cst_125 = arith.constant 1.400000e+01 : f32
    %317 = vector.broadcast %cst_125 : f32 to vector<8x128xf32>
    %318 = arith.cmpf oeq, %229, %317 : vector<8x128xf32>
    %319 = arith.select %318, %315, %313 : vector<8x128xi1>, vector<8x128xf32>
    %c20 = arith.constant 20 : index
    %c0_126 = arith.constant 0 : index
    %c0_127 = arith.constant 0 : index
    %320 = vector.load %arg5[%c20, %c0_126, %c0_127] : memref<25x8x128xf32, #tpu.memory_space<vmem>>, vector<1x8x128xf32>
    %321 = vector.shape_cast %320 : vector<1x8x128xf32> to vector<8x128xf32>
    %322 = arith.maximumf %316, %321 : vector<8x128xf32>
    %cst_128 = arith.constant 1.500000e+01 : f32
    %323 = vector.broadcast %cst_128 : f32 to vector<8x128xf32>
    %324 = arith.cmpf oeq, %229, %323 : vector<8x128xf32>
    %325 = arith.select %324, %321, %319 : vector<8x128xi1>, vector<8x128xf32>
    %c21 = arith.constant 21 : index
    %c0_129 = arith.constant 0 : index
    %c0_130 = arith.constant 0 : index
    %326 = vector.load %arg5[%c21, %c0_129, %c0_130] : memref<25x8x128xf32, #tpu.memory_space<vmem>>, vector<1x8x128xf32>
    %327 = vector.shape_cast %326 : vector<1x8x128xf32> to vector<8x128xf32>
    %328 = arith.maximumf %322, %327 : vector<8x128xf32>
    %cst_131 = arith.constant 1.600000e+01 : f32
    %329 = vector.broadcast %cst_131 : f32 to vector<8x128xf32>
    %330 = arith.cmpf oeq, %229, %329 : vector<8x128xf32>
    %331 = arith.select %330, %327, %325 : vector<8x128xi1>, vector<8x128xf32>
    %c22 = arith.constant 22 : index
    %c0_132 = arith.constant 0 : index
    %c0_133 = arith.constant 0 : index
    %332 = vector.load %arg5[%c22, %c0_132, %c0_133] : memref<25x8x128xf32, #tpu.memory_space<vmem>>, vector<1x8x128xf32>
    %333 = vector.shape_cast %332 : vector<1x8x128xf32> to vector<8x128xf32>
    %334 = arith.maximumf %328, %333 : vector<8x128xf32>
    %cst_134 = arith.constant 1.700000e+01 : f32
    %335 = vector.broadcast %cst_134 : f32 to vector<8x128xf32>
    %336 = arith.cmpf oeq, %229, %335 : vector<8x128xf32>
    %337 = arith.select %336, %333, %331 : vector<8x128xi1>, vector<8x128xf32>
    %c23 = arith.constant 23 : index
    %c0_135 = arith.constant 0 : index
    %c0_136 = arith.constant 0 : index
    %338 = vector.load %arg5[%c23, %c0_135, %c0_136] : memref<25x8x128xf32, #tpu.memory_space<vmem>>, vector<1x8x128xf32>
    %339 = vector.shape_cast %338 : vector<1x8x128xf32> to vector<8x128xf32>
    %340 = arith.maximumf %334, %339 : vector<8x128xf32>
    %cst_137 = arith.constant 1.800000e+01 : f32
    %341 = vector.broadcast %cst_137 : f32 to vector<8x128xf32>
    %342 = arith.cmpf oeq, %229, %341 : vector<8x128xf32>
    %343 = arith.select %342, %339, %337 : vector<8x128xi1>, vector<8x128xf32>
    %c24 = arith.constant 24 : index
    %c0_138 = arith.constant 0 : index
    %c0_139 = arith.constant 0 : index
    %344 = vector.load %arg5[%c24, %c0_138, %c0_139] : memref<25x8x128xf32, #tpu.memory_space<vmem>>, vector<1x8x128xf32>
    %345 = vector.shape_cast %344 : vector<1x8x128xf32> to vector<8x128xf32>
    %346 = arith.maximumf %340, %345 : vector<8x128xf32>
    %cst_140 = arith.constant 1.900000e+01 : f32
    %347 = vector.broadcast %cst_140 : f32 to vector<8x128xf32>
    %348 = arith.cmpf oeq, %229, %347 : vector<8x128xf32>
    %349 = arith.select %348, %345, %343 : vector<8x128xi1>, vector<8x128xf32>
    %cst_141 = arith.constant 0.000000e+00 : f32
    %350 = vector.broadcast %cst_141 : f32 to vector<8x128xf32>
    %351 = arith.maximumf %346, %350 : vector<8x128xf32>
    %cst_142 = arith.constant 0.000000e+00 : f32
    %352 = vector.broadcast %cst_142 : f32 to vector<8x128xf32>
    %353 = arith.subf %352, %351 : vector<8x128xf32>
    %354 = math.exp %353 : vector<8x128xf32>
    %cst_143 = arith.constant 0.000000e+00 : f32
    %355 = vector.broadcast %cst_143 : f32 to vector<8x128xf32>
    %356 = arith.minimumf %346, %355 : vector<8x128xf32>
    %357 = math.exp %356 : vector<8x128xf32>
    %cst_144 = arith.constant 0.000000e+00 : f32
    %358 = vector.broadcast %cst_144 : f32 to vector<8x128xf32>
    %cst_145 = arith.constant 0.000000e+00 : f32
    %359 = vector.broadcast %cst_145 : f32 to vector<8x128xf32>
    %c5_146 = arith.constant 5 : index
    %c0_147 = arith.constant 0 : index
    %c0_148 = arith.constant 0 : index
    %360 = vector.load %arg5[%c5_146, %c0_147, %c0_148] : memref<25x8x128xf32, #tpu.memory_space<vmem>>, vector<1x8x128xf32>
    %361 = vector.shape_cast %360 : vector<1x8x128xf32> to vector<8x128xf32>
    %362 = arith.subf %361, %346 : vector<8x128xf32>
    %363 = math.exp %362 : vector<8x128xf32>
    %364 = arith.addf %358, %363 : vector<8x128xf32>
    %365 = arith.mulf %363, %357 : vector<8x128xf32>
    %366 = arith.addf %354, %365 : vector<8x128xf32>
    %367 = math.log %366 : vector<8x128xf32>
    %368 = arith.addf %359, %367 : vector<8x128xf32>
    %c6_149 = arith.constant 6 : index
    %c0_150 = arith.constant 0 : index
    %c0_151 = arith.constant 0 : index
    %369 = vector.load %arg5[%c6_149, %c0_150, %c0_151] : memref<25x8x128xf32, #tpu.memory_space<vmem>>, vector<1x8x128xf32>
    %370 = vector.shape_cast %369 : vector<1x8x128xf32> to vector<8x128xf32>
    %371 = arith.subf %370, %346 : vector<8x128xf32>
    %372 = math.exp %371 : vector<8x128xf32>
    %373 = arith.addf %364, %372 : vector<8x128xf32>
    %374 = arith.mulf %372, %357 : vector<8x128xf32>
    %375 = arith.addf %354, %374 : vector<8x128xf32>
    %376 = math.log %375 : vector<8x128xf32>
    %377 = arith.addf %368, %376 : vector<8x128xf32>
    %c7_152 = arith.constant 7 : index
    %c0_153 = arith.constant 0 : index
    %c0_154 = arith.constant 0 : index
    %378 = vector.load %arg5[%c7_152, %c0_153, %c0_154] : memref<25x8x128xf32, #tpu.memory_space<vmem>>, vector<1x8x128xf32>
    %379 = vector.shape_cast %378 : vector<1x8x128xf32> to vector<8x128xf32>
    %380 = arith.subf %379, %346 : vector<8x128xf32>
    %381 = math.exp %380 : vector<8x128xf32>
    %382 = arith.addf %373, %381 : vector<8x128xf32>
    %383 = arith.mulf %381, %357 : vector<8x128xf32>
    %384 = arith.addf %354, %383 : vector<8x128xf32>
    %385 = math.log %384 : vector<8x128xf32>
    %386 = arith.addf %377, %385 : vector<8x128xf32>
    %c8_155 = arith.constant 8 : index
    %c0_156 = arith.constant 0 : index
    %c0_157 = arith.constant 0 : index
    %387 = vector.load %arg5[%c8_155, %c0_156, %c0_157] : memref<25x8x128xf32, #tpu.memory_space<vmem>>, vector<1x8x128xf32>
    %388 = vector.shape_cast %387 : vector<1x8x128xf32> to vector<8x128xf32>
    %389 = arith.subf %388, %346 : vector<8x128xf32>
    %390 = math.exp %389 : vector<8x128xf32>
    %391 = arith.addf %382, %390 : vector<8x128xf32>
    %392 = arith.mulf %390, %357 : vector<8x128xf32>
    %393 = arith.addf %354, %392 : vector<8x128xf32>
    %394 = math.log %393 : vector<8x128xf32>
    %395 = arith.addf %386, %394 : vector<8x128xf32>
    %c9_158 = arith.constant 9 : index
    %c0_159 = arith.constant 0 : index
    %c0_160 = arith.constant 0 : index
    %396 = vector.load %arg5[%c9_158, %c0_159, %c0_160] : memref<25x8x128xf32, #tpu.memory_space<vmem>>, vector<1x8x128xf32>
    %397 = vector.shape_cast %396 : vector<1x8x128xf32> to vector<8x128xf32>
    %398 = arith.subf %397, %346 : vector<8x128xf32>
    %399 = math.exp %398 : vector<8x128xf32>
    %400 = arith.addf %391, %399 : vector<8x128xf32>
    %401 = arith.mulf %399, %357 : vector<8x128xf32>
    %402 = arith.addf %354, %401 : vector<8x128xf32>
    %403 = math.log %402 : vector<8x128xf32>
    %404 = arith.addf %395, %403 : vector<8x128xf32>
    %c10_161 = arith.constant 10 : index
    %c0_162 = arith.constant 0 : index
    %c0_163 = arith.constant 0 : index
    %405 = vector.load %arg5[%c10_161, %c0_162, %c0_163] : memref<25x8x128xf32, #tpu.memory_space<vmem>>, vector<1x8x128xf32>
    %406 = vector.shape_cast %405 : vector<1x8x128xf32> to vector<8x128xf32>
    %407 = arith.subf %406, %346 : vector<8x128xf32>
    %408 = math.exp %407 : vector<8x128xf32>
    %409 = arith.addf %400, %408 : vector<8x128xf32>
    %410 = arith.mulf %408, %357 : vector<8x128xf32>
    %411 = arith.addf %354, %410 : vector<8x128xf32>
    %412 = math.log %411 : vector<8x128xf32>
    %413 = arith.addf %404, %412 : vector<8x128xf32>
    %c11_164 = arith.constant 11 : index
    %c0_165 = arith.constant 0 : index
    %c0_166 = arith.constant 0 : index
    %414 = vector.load %arg5[%c11_164, %c0_165, %c0_166] : memref<25x8x128xf32, #tpu.memory_space<vmem>>, vector<1x8x128xf32>
    %415 = vector.shape_cast %414 : vector<1x8x128xf32> to vector<8x128xf32>
    %416 = arith.subf %415, %346 : vector<8x128xf32>
    %417 = math.exp %416 : vector<8x128xf32>
    %418 = arith.addf %409, %417 : vector<8x128xf32>
    %419 = arith.mulf %417, %357 : vector<8x128xf32>
    %420 = arith.addf %354, %419 : vector<8x128xf32>
    %421 = math.log %420 : vector<8x128xf32>
    %422 = arith.addf %413, %421 : vector<8x128xf32>
    %c12_167 = arith.constant 12 : index
    %c0_168 = arith.constant 0 : index
    %c0_169 = arith.constant 0 : index
    %423 = vector.load %arg5[%c12_167, %c0_168, %c0_169] : memref<25x8x128xf32, #tpu.memory_space<vmem>>, vector<1x8x128xf32>
    %424 = vector.shape_cast %423 : vector<1x8x128xf32> to vector<8x128xf32>
    %425 = arith.subf %424, %346 : vector<8x128xf32>
    %426 = math.exp %425 : vector<8x128xf32>
    %427 = arith.addf %418, %426 : vector<8x128xf32>
    %428 = arith.mulf %426, %357 : vector<8x128xf32>
    %429 = arith.addf %354, %428 : vector<8x128xf32>
    %430 = math.log %429 : vector<8x128xf32>
    %431 = arith.addf %422, %430 : vector<8x128xf32>
    %c13_170 = arith.constant 13 : index
    %c0_171 = arith.constant 0 : index
    %c0_172 = arith.constant 0 : index
    %432 = vector.load %arg5[%c13_170, %c0_171, %c0_172] : memref<25x8x128xf32, #tpu.memory_space<vmem>>, vector<1x8x128xf32>
    %433 = vector.shape_cast %432 : vector<1x8x128xf32> to vector<8x128xf32>
    %434 = arith.subf %433, %346 : vector<8x128xf32>
    %435 = math.exp %434 : vector<8x128xf32>
    %436 = arith.addf %427, %435 : vector<8x128xf32>
    %437 = arith.mulf %435, %357 : vector<8x128xf32>
    %438 = arith.addf %354, %437 : vector<8x128xf32>
    %439 = math.log %438 : vector<8x128xf32>
    %440 = arith.addf %431, %439 : vector<8x128xf32>
    %c14_173 = arith.constant 14 : index
    %c0_174 = arith.constant 0 : index
    %c0_175 = arith.constant 0 : index
    %441 = vector.load %arg5[%c14_173, %c0_174, %c0_175] : memref<25x8x128xf32, #tpu.memory_space<vmem>>, vector<1x8x128xf32>
    %442 = vector.shape_cast %441 : vector<1x8x128xf32> to vector<8x128xf32>
    %443 = arith.subf %442, %346 : vector<8x128xf32>
    %444 = math.exp %443 : vector<8x128xf32>
    %445 = arith.addf %436, %444 : vector<8x128xf32>
    %446 = arith.mulf %444, %357 : vector<8x128xf32>
    %447 = arith.addf %354, %446 : vector<8x128xf32>
    %448 = math.log %447 : vector<8x128xf32>
    %449 = arith.addf %440, %448 : vector<8x128xf32>
    %c15_176 = arith.constant 15 : index
    %c0_177 = arith.constant 0 : index
    %c0_178 = arith.constant 0 : index
    %450 = vector.load %arg5[%c15_176, %c0_177, %c0_178] : memref<25x8x128xf32, #tpu.memory_space<vmem>>, vector<1x8x128xf32>
    %451 = vector.shape_cast %450 : vector<1x8x128xf32> to vector<8x128xf32>
    %452 = arith.subf %451, %346 : vector<8x128xf32>
    %453 = math.exp %452 : vector<8x128xf32>
    %454 = arith.addf %445, %453 : vector<8x128xf32>
    %455 = arith.mulf %453, %357 : vector<8x128xf32>
    %456 = arith.addf %354, %455 : vector<8x128xf32>
    %457 = math.log %456 : vector<8x128xf32>
    %458 = arith.addf %449, %457 : vector<8x128xf32>
    %c16_179 = arith.constant 16 : index
    %c0_180 = arith.constant 0 : index
    %c0_181 = arith.constant 0 : index
    %459 = vector.load %arg5[%c16_179, %c0_180, %c0_181] : memref<25x8x128xf32, #tpu.memory_space<vmem>>, vector<1x8x128xf32>
    %460 = vector.shape_cast %459 : vector<1x8x128xf32> to vector<8x128xf32>
    %461 = arith.subf %460, %346 : vector<8x128xf32>
    %462 = math.exp %461 : vector<8x128xf32>
    %463 = arith.addf %454, %462 : vector<8x128xf32>
    %464 = arith.mulf %462, %357 : vector<8x128xf32>
    %465 = arith.addf %354, %464 : vector<8x128xf32>
    %466 = math.log %465 : vector<8x128xf32>
    %467 = arith.addf %458, %466 : vector<8x128xf32>
    %c17_182 = arith.constant 17 : index
    %c0_183 = arith.constant 0 : index
    %c0_184 = arith.constant 0 : index
    %468 = vector.load %arg5[%c17_182, %c0_183, %c0_184] : memref<25x8x128xf32, #tpu.memory_space<vmem>>, vector<1x8x128xf32>
    %469 = vector.shape_cast %468 : vector<1x8x128xf32> to vector<8x128xf32>
    %470 = arith.subf %469, %346 : vector<8x128xf32>
    %471 = math.exp %470 : vector<8x128xf32>
    %472 = arith.addf %463, %471 : vector<8x128xf32>
    %473 = arith.mulf %471, %357 : vector<8x128xf32>
    %474 = arith.addf %354, %473 : vector<8x128xf32>
    %475 = math.log %474 : vector<8x128xf32>
    %476 = arith.addf %467, %475 : vector<8x128xf32>
    %c18_185 = arith.constant 18 : index
    %c0_186 = arith.constant 0 : index
    %c0_187 = arith.constant 0 : index
    %477 = vector.load %arg5[%c18_185, %c0_186, %c0_187] : memref<25x8x128xf32, #tpu.memory_space<vmem>>, vector<1x8x128xf32>
    %478 = vector.shape_cast %477 : vector<1x8x128xf32> to vector<8x128xf32>
    %479 = arith.subf %478, %346 : vector<8x128xf32>
    %480 = math.exp %479 : vector<8x128xf32>
    %481 = arith.addf %472, %480 : vector<8x128xf32>
    %482 = arith.mulf %480, %357 : vector<8x128xf32>
    %483 = arith.addf %354, %482 : vector<8x128xf32>
    %484 = math.log %483 : vector<8x128xf32>
    %485 = arith.addf %476, %484 : vector<8x128xf32>
    %c19_188 = arith.constant 19 : index
    %c0_189 = arith.constant 0 : index
    %c0_190 = arith.constant 0 : index
    %486 = vector.load %arg5[%c19_188, %c0_189, %c0_190] : memref<25x8x128xf32, #tpu.memory_space<vmem>>, vector<1x8x128xf32>
    %487 = vector.shape_cast %486 : vector<1x8x128xf32> to vector<8x128xf32>
    %488 = arith.subf %487, %346 : vector<8x128xf32>
    %489 = math.exp %488 : vector<8x128xf32>
    %490 = arith.addf %481, %489 : vector<8x128xf32>
    %491 = arith.mulf %489, %357 : vector<8x128xf32>
    %492 = arith.addf %354, %491 : vector<8x128xf32>
    %493 = math.log %492 : vector<8x128xf32>
    %494 = arith.addf %485, %493 : vector<8x128xf32>
    %c20_191 = arith.constant 20 : index
    %c0_192 = arith.constant 0 : index
    %c0_193 = arith.constant 0 : index
    %495 = vector.load %arg5[%c20_191, %c0_192, %c0_193] : memref<25x8x128xf32, #tpu.memory_space<vmem>>, vector<1x8x128xf32>
    %496 = vector.shape_cast %495 : vector<1x8x128xf32> to vector<8x128xf32>
    %497 = arith.subf %496, %346 : vector<8x128xf32>
    %498 = math.exp %497 : vector<8x128xf32>
    %499 = arith.addf %490, %498 : vector<8x128xf32>
    %500 = arith.mulf %498, %357 : vector<8x128xf32>
    %501 = arith.addf %354, %500 : vector<8x128xf32>
    %502 = math.log %501 : vector<8x128xf32>
    %503 = arith.addf %494, %502 : vector<8x128xf32>
    %c21_194 = arith.constant 21 : index
    %c0_195 = arith.constant 0 : index
    %c0_196 = arith.constant 0 : index
    %504 = vector.load %arg5[%c21_194, %c0_195, %c0_196] : memref<25x8x128xf32, #tpu.memory_space<vmem>>, vector<1x8x128xf32>
    %505 = vector.shape_cast %504 : vector<1x8x128xf32> to vector<8x128xf32>
    %506 = arith.subf %505, %346 : vector<8x128xf32>
    %507 = math.exp %506 : vector<8x128xf32>
    %508 = arith.addf %499, %507 : vector<8x128xf32>
    %509 = arith.mulf %507, %357 : vector<8x128xf32>
    %510 = arith.addf %354, %509 : vector<8x128xf32>
    %511 = math.log %510 : vector<8x128xf32>
    %512 = arith.addf %503, %511 : vector<8x128xf32>
    %c22_197 = arith.constant 22 : index
    %c0_198 = arith.constant 0 : index
    %c0_199 = arith.constant 0 : index
    %513 = vector.load %arg5[%c22_197, %c0_198, %c0_199] : memref<25x8x128xf32, #tpu.memory_space<vmem>>, vector<1x8x128xf32>
    %514 = vector.shape_cast %513 : vector<1x8x128xf32> to vector<8x128xf32>
    %515 = arith.subf %514, %346 : vector<8x128xf32>
    %516 = math.exp %515 : vector<8x128xf32>
    %517 = arith.addf %508, %516 : vector<8x128xf32>
    %518 = arith.mulf %516, %357 : vector<8x128xf32>
    %519 = arith.addf %354, %518 : vector<8x128xf32>
    %520 = math.log %519 : vector<8x128xf32>
    %521 = arith.addf %512, %520 : vector<8x128xf32>
    %c23_200 = arith.constant 23 : index
    %c0_201 = arith.constant 0 : index
    %c0_202 = arith.constant 0 : index
    %522 = vector.load %arg5[%c23_200, %c0_201, %c0_202] : memref<25x8x128xf32, #tpu.memory_space<vmem>>, vector<1x8x128xf32>
    %523 = vector.shape_cast %522 : vector<1x8x128xf32> to vector<8x128xf32>
    %524 = arith.subf %523, %346 : vector<8x128xf32>
    %525 = math.exp %524 : vector<8x128xf32>
    %526 = arith.addf %517, %525 : vector<8x128xf32>
    %527 = arith.mulf %525, %357 : vector<8x128xf32>
    %528 = arith.addf %354, %527 : vector<8x128xf32>
    %529 = math.log %528 : vector<8x128xf32>
    %530 = arith.addf %521, %529 : vector<8x128xf32>
    %c24_203 = arith.constant 24 : index
    %c0_204 = arith.constant 0 : index
    %c0_205 = arith.constant 0 : index
    %531 = vector.load %arg5[%c24_203, %c0_204, %c0_205] : memref<25x8x128xf32, #tpu.memory_space<vmem>>, vector<1x8x128xf32>
    %532 = vector.shape_cast %531 : vector<1x8x128xf32> to vector<8x128xf32>
    %533 = arith.subf %532, %346 : vector<8x128xf32>
    %534 = math.exp %533 : vector<8x128xf32>
    %535 = arith.addf %526, %534 : vector<8x128xf32>
    %536 = arith.mulf %534, %357 : vector<8x128xf32>
    %537 = arith.addf %354, %536 : vector<8x128xf32>
    %538 = math.log %537 : vector<8x128xf32>
    %539 = arith.addf %530, %538 : vector<8x128xf32>
    %540 = math.log %535 : vector<8x128xf32>
    %541 = arith.addf %346, %540 : vector<8x128xf32>
    %542 = arith.subf %541, %349 : vector<8x128xf32>
    %cst_206 = arith.constant 2.000000e+01 : f32
    %543 = vector.broadcast %cst_206 : f32 to vector<8x128xf32>
    %544 = arith.mulf %543, %351 : vector<8x128xf32>
    %545 = arith.addf %544, %539 : vector<8x128xf32>
    %546 = arith.subf %545, %349 : vector<8x128xf32>
    %c0_207 = arith.constant 0 : index
    %c0_208 = arith.constant 0 : index
    %c0_209 = arith.constant 0 : index
    %547 = vector.load %arg8[%c0_207, %c0_208, %c0_209] : memref<8x8x128xf32, #tpu.memory_space<vmem>>, vector<1x8x128xf32>
    %548 = vector.shape_cast %547 : vector<1x8x128xf32> to vector<8x128xf32>
    %549 = arith.addf %548, %104 : vector<8x128xf32>
    %c0_210 = arith.constant 0 : index
    %c0_211 = arith.constant 0 : index
    %c0_212 = arith.constant 0 : index
    %550 = vector.load %arg8[%c0_210, %c0_211, %c0_212] : memref<8x8x128xf32, #tpu.memory_space<vmem>>, vector<1x8x128xf32>
    %551 = vector.shape_cast %550 : vector<1x8x128xf32> to vector<8x128xf32>
    %552 = vector.shape_cast %549 : vector<8x128xf32> to vector<1x8x128xf32>
    tpu.vector_store %arg8[%c0_210, %c0_211, %c0_212], %552 {strides = array<i32>} : memref<8x8x128xf32, #tpu.memory_space<vmem>>, vector<1x8x128xf32>,
    %c1_213 = arith.constant 1 : index
    %c0_214 = arith.constant 0 : index
    %c0_215 = arith.constant 0 : index
    %553 = vector.load %arg8[%c1_213, %c0_214, %c0_215] : memref<8x8x128xf32, #tpu.memory_space<vmem>>, vector<1x8x128xf32>
    %554 = vector.shape_cast %553 : vector<1x8x128xf32> to vector<8x128xf32>
    %555 = arith.addf %554, %109 : vector<8x128xf32>
    %c1_216 = arith.constant 1 : index
    %c0_217 = arith.constant 0 : index
    %c0_218 = arith.constant 0 : index
    %556 = vector.load %arg8[%c1_216, %c0_217, %c0_218] : memref<8x8x128xf32, #tpu.memory_space<vmem>>, vector<1x8x128xf32>
    %557 = vector.shape_cast %556 : vector<1x8x128xf32> to vector<8x128xf32>
    %558 = vector.shape_cast %555 : vector<8x128xf32> to vector<1x8x128xf32>
    tpu.vector_store %arg8[%c1_216, %c0_217, %c0_218], %558 {strides = array<i32>} : memref<8x8x128xf32, #tpu.memory_space<vmem>>, vector<1x8x128xf32>,
    %c2_219 = arith.constant 2 : index
    %c0_220 = arith.constant 0 : index
    %c0_221 = arith.constant 0 : index
    %559 = vector.load %arg8[%c2_219, %c0_220, %c0_221] : memref<8x8x128xf32, #tpu.memory_space<vmem>>, vector<1x8x128xf32>
    %560 = vector.shape_cast %559 : vector<1x8x128xf32> to vector<8x128xf32>
    %561 = arith.mulf %123, %109 : vector<8x128xf32>
    %562 = arith.addf %560, %561 : vector<8x128xf32>
    %c2_222 = arith.constant 2 : index
    %c0_223 = arith.constant 0 : index
    %c0_224 = arith.constant 0 : index
    %563 = vector.load %arg8[%c2_222, %c0_223, %c0_224] : memref<8x8x128xf32, #tpu.memory_space<vmem>>, vector<1x8x128xf32>
    %564 = vector.shape_cast %563 : vector<1x8x128xf32> to vector<8x128xf32>
    %565 = vector.shape_cast %562 : vector<8x128xf32> to vector<1x8x128xf32>
    tpu.vector_store %arg8[%c2_222, %c0_223, %c0_224], %565 {strides = array<i32>} : memref<8x8x128xf32, #tpu.memory_space<vmem>>, vector<1x8x128xf32>,
    %c3_225 = arith.constant 3 : index
    %c0_226 = arith.constant 0 : index
    %c0_227 = arith.constant 0 : index
    %566 = vector.load %arg8[%c3_225, %c0_226, %c0_227] : memref<8x8x128xf32, #tpu.memory_space<vmem>>, vector<1x8x128xf32>
    %567 = vector.shape_cast %566 : vector<1x8x128xf32> to vector<8x128xf32>
    %568 = arith.mulf %123, %104 : vector<8x128xf32>
    %569 = arith.addf %567, %568 : vector<8x128xf32>
    %c3_228 = arith.constant 3 : index
    %c0_229 = arith.constant 0 : index
    %c0_230 = arith.constant 0 : index
    %570 = vector.load %arg8[%c3_228, %c0_229, %c0_230] : memref<8x8x128xf32, #tpu.memory_space<vmem>>, vector<1x8x128xf32>
    %571 = vector.shape_cast %570 : vector<1x8x128xf32> to vector<8x128xf32>
    %572 = vector.shape_cast %569 : vector<8x128xf32> to vector<1x8x128xf32>
    tpu.vector_store %arg8[%c3_228, %c0_229, %c0_230], %572 {strides = array<i32>} : memref<8x8x128xf32, #tpu.memory_space<vmem>>, vector<1x8x128xf32>,
    %c4_231 = arith.constant 4 : index
    %c0_232 = arith.constant 0 : index
    %c0_233 = arith.constant 0 : index
    %573 = vector.load %arg8[%c4_231, %c0_232, %c0_233] : memref<8x8x128xf32, #tpu.memory_space<vmem>>, vector<1x8x128xf32>
    %574 = vector.shape_cast %573 : vector<1x8x128xf32> to vector<8x128xf32>
    %575 = arith.mulf %208, %104 : vector<8x128xf32>
    %576 = arith.addf %574, %575 : vector<8x128xf32>
    %c4_234 = arith.constant 4 : index
    %c0_235 = arith.constant 0 : index
    %c0_236 = arith.constant 0 : index
    %577 = vector.load %arg8[%c4_234, %c0_235, %c0_236] : memref<8x8x128xf32, #tpu.memory_space<vmem>>, vector<1x8x128xf32>
    %578 = vector.shape_cast %577 : vector<1x8x128xf32> to vector<8x128xf32>
    %579 = vector.shape_cast %576 : vector<8x128xf32> to vector<1x8x128xf32>
    tpu.vector_store %arg8[%c4_234, %c0_235, %c0_236], %579 {strides = array<i32>} : memref<8x8x128xf32, #tpu.memory_space<vmem>>, vector<1x8x128xf32>,
    %c5_237 = arith.constant 5 : index
    %c0_238 = arith.constant 0 : index
    %c0_239 = arith.constant 0 : index
    %580 = vector.load %arg8[%c5_237, %c0_238, %c0_239] : memref<8x8x128xf32, #tpu.memory_space<vmem>>, vector<1x8x128xf32>
    %581 = vector.shape_cast %580 : vector<1x8x128xf32> to vector<8x128xf32>
    %582 = arith.mulf %227, %104 : vector<8x128xf32>
    %583 = arith.addf %581, %582 : vector<8x128xf32>
    %c5_240 = arith.constant 5 : index
    %c0_241 = arith.constant 0 : index
    %c0_242 = arith.constant 0 : index
    %584 = vector.load %arg8[%c5_240, %c0_241, %c0_242] : memref<8x8x128xf32, #tpu.memory_space<vmem>>, vector<1x8x128xf32>
    %585 = vector.shape_cast %584 : vector<1x8x128xf32> to vector<8x128xf32>
    %586 = vector.shape_cast %583 : vector<8x128xf32> to vector<1x8x128xf32>
    tpu.vector_store %arg8[%c5_240, %c0_241, %c0_242], %586 {strides = array<i32>} : memref<8x8x128xf32, #tpu.memory_space<vmem>>, vector<1x8x128xf32>,
    %c6_243 = arith.constant 6 : index
    %c0_244 = arith.constant 0 : index
    %c0_245 = arith.constant 0 : index
    %587 = vector.load %arg8[%c6_243, %c0_244, %c0_245] : memref<8x8x128xf32, #tpu.memory_space<vmem>>, vector<1x8x128xf32>
    %588 = vector.shape_cast %587 : vector<1x8x128xf32> to vector<8x128xf32>
    %589 = arith.mulf %542, %104 : vector<8x128xf32>
    %590 = arith.addf %588, %589 : vector<8x128xf32>
    %c6_246 = arith.constant 6 : index
    %c0_247 = arith.constant 0 : index
    %c0_248 = arith.constant 0 : index
    %591 = vector.load %arg8[%c6_246, %c0_247, %c0_248] : memref<8x8x128xf32, #tpu.memory_space<vmem>>, vector<1x8x128xf32>
    %592 = vector.shape_cast %591 : vector<1x8x128xf32> to vector<8x128xf32>
    %593 = vector.shape_cast %590 : vector<8x128xf32> to vector<1x8x128xf32>
    tpu.vector_store %arg8[%c6_246, %c0_247, %c0_248], %593 {strides = array<i32>} : memref<8x8x128xf32, #tpu.memory_space<vmem>>, vector<1x8x128xf32>,
    %c7_249 = arith.constant 7 : index
    %c0_250 = arith.constant 0 : index
    %c0_251 = arith.constant 0 : index
    %594 = vector.load %arg8[%c7_249, %c0_250, %c0_251] : memref<8x8x128xf32, #tpu.memory_space<vmem>>, vector<1x8x128xf32>
    %595 = vector.shape_cast %594 : vector<1x8x128xf32> to vector<8x128xf32>
    %596 = arith.mulf %546, %104 : vector<8x128xf32>
    %597 = arith.addf %595, %596 : vector<8x128xf32>
    %c7_252 = arith.constant 7 : index
    %c0_253 = arith.constant 0 : index
    %c0_254 = arith.constant 0 : index
    %598 = vector.load %arg8[%c7_252, %c0_253, %c0_254] : memref<8x8x128xf32, #tpu.memory_space<vmem>>, vector<1x8x128xf32>
    %599 = vector.shape_cast %598 : vector<1x8x128xf32> to vector<8x128xf32>
    %600 = vector.shape_cast %597 : vector<8x128xf32> to vector<1x8x128xf32>
    tpu.vector_store %arg8[%c7_252, %c0_253, %c0_254], %600 {strides = array<i32>} : memref<8x8x128xf32, #tpu.memory_space<vmem>>, vector<1x8x128xf32>,
    %c0_i32_255 = arith.constant 0 : i32
    %601 = arith.cmpi eq, %arg1, %c0_i32_255 : i32
    %602 = arith.extui %601 : i1 to i32
    %c0_i32_256 = arith.constant 0 : i32
    %603 = arith.cmpi ne, %602, %c0_i32_256 : i32
    scf.if %603 {
      %c0_257 = arith.constant 0 : index
      %c0_258 = arith.constant 0 : index
      %c0_259 = arith.constant 0 : index
      %604 = vector.load %arg8[%c0_257, %c0_258, %c0_259] : memref<8x8x128xf32, #tpu.memory_space<vmem>>, vector<8x8x128xf32>
      %cst_260 = arith.constant dense<0.000000e+00> : vector<8x8xf32>
      %605 = vector.multi_reduction <add>, %604, %cst_260 [2] : vector<8x8x128xf32> to vector<8x8xf32>
      %606 = vector.shape_cast %605 : vector<8x8xf32> to vector<8x8x1xf32>
      %cst_261 = arith.constant dense<0.000000e+00> : vector<8x1xf32>
      %607 = vector.multi_reduction <add>, %606, %cst_261 [1] : vector<8x8x1xf32> to vector<8x1xf32>
      %608 = vector.shape_cast %607 : vector<8x1xf32> to vector<8x1x1xf32>
      %c0_262 = arith.constant 0 : index
      %c0_263 = arith.constant 0 : index
      %c0_264 = arith.constant 0 : index
      %609 = vector.load %arg7[%c0_262, %c0_263, %c0_264] : memref<8x1x1xf32, #tpu.memory_space<vmem>>, vector<8x1x1xf32>
      tpu.vector_store %arg7[%c0_262, %c0_263, %c0_264], %608 {strides = array<i32>} : memref<8x1x1xf32, #tpu.memory_space<vmem>>, vector<8x1x1xf32>,
    } else {
    }
    return
  }
  func.func @transform_0(%arg0: i32, %arg1: i32, %arg2: memref<12xf32, #tpu.memory_space<smem>>, %arg3: memref<1xi32, #tpu.memory_space<smem>>, %arg4: memref<1xi32, #tpu.memory_space<smem>>) -> (i32, i32, i32) {
    %c1_i32 = arith.constant 1 : i32
    %0 = arith.muli %arg0, %c1_i32 : i32
    %1 = arith.addi %0, %arg1 : i32
    %c0_i32 = arith.constant 0 : i32
    %c0_i32_0 = arith.constant 0 : i32
    %c0_i32_1 = arith.constant 0 : i32
    return %c0_i32, %1, %c0_i32_0 : i32, i32, i32
  }
  func.func @transform_1(%arg0: i32, %arg1: i32, %arg2: memref<12xf32, #tpu.memory_space<smem>>, %arg3: memref<1xi32, #tpu.memory_space<smem>>, %arg4: memref<1xi32, #tpu.memory_space<smem>>) -> (i32, i32, i32) {
    %c1_i32 = arith.constant 1 : i32
    %0 = arith.muli %arg0, %c1_i32 : i32
    %1 = arith.addi %0, %arg1 : i32
    %c0_i32 = arith.constant 0 : i32
    %c0_i32_0 = arith.constant 0 : i32
    %c0_i32_1 = arith.constant 0 : i32
    return %c0_i32, %1, %c0_i32_0 : i32, i32, i32
  }
  func.func @transform_2(%arg0: i32, %arg1: i32, %arg2: memref<12xf32, #tpu.memory_space<smem>>, %arg3: memref<1xi32, #tpu.memory_space<smem>>, %arg4: memref<1xi32, #tpu.memory_space<smem>>) -> (i32, i32, i32) {
    %c0_i32 = arith.constant 0 : i32
    %c0_i32_0 = arith.constant 0 : i32
    %c0_i32_1 = arith.constant 0 : i32
    return %arg0, %c0_i32, %c0_i32_0 : i32, i32, i32
  }
}

</mosaic_0001>

<bundles_post_ra>
// kernel: yolo_loss_pallas.1
= control target key start
LH: loop header
LB: loop body
LE: loop exit
PB: predicated region body
PF: predicated region fallthrough
CT: control target
= control target key end

     0   :  { %s1365_s0 = inlined_call_operand.vmem [shape: f32[12], index: 0, kind: input, shape index: {}]   ;;  %s1366_s1 = inlined_call_operand.<no memory space> [shape: s32[1], index: 1, kind: input, shape index: {}, may-alias: {1,2}]   ;;  %s1367_s2 = inlined_call_operand.<no memory space> [shape: s32[1], index: 2, kind: input, shape index: {}, may-alias: {1,2}]   ;;  %s1368_s3 = inlined_call_operand.vmem [shape: f32[25,8,128], index: 3, kind: input, shape index: {}]   ;;  %s1369_s4 = inlined_call_operand.vmem [shape: f32[6,8,128], index: 4, kind: input, shape index: {}]   ;;  %s1370_s5 = inlined_call_operand.vmem [shape: f32[8,1,1], index: 5, kind: output, shape index: {}]  }
   0x1   :  { %s10_s20 = sshll.u32 %s1365_s0, 4  ;;  %s11_s20 = int_to_ptr.vmem [resolvable:$true] %s10_s20 }
   0x2   :  { %s840_s21 = scalar_lea.vmem %s11_s20, 16  ;;  %p845_p1 = scmp.lt.s32.totalorder %s11_s20, %s11_s20 }
   0x3   :  { %p841_p0 = scmp.ne.s32.totalorder %s11_s20, %s840_s21  ;;  %p846_p2 = scmp.lt.s32.totalorder %s840_s21, %s840_s21 }
   0x5   :  { %p847_p3 = por %p846_p2, %p845_p1 }
   0x7   :  { %p848_p4 = pnand %p847_p3, %p841_p0 }
   0x9   :  { %851 = shalt.err (!%p848_p4)  }
   0xa   :  { %s854_s22 = smov [#allocation4]  }
   0xb   :  { %13 = dma.vmem_to_smem %s11_s20, 16, %s854_s22, [#allocation3] }
   0xc   :  { %852 = dma.done.wait [#allocation3], 16 }
   0xd   :  { %853 = vsyncadd [#allocation3], 4294967280 }
   0xe   :  { %17 = sfence }
   0xf   :  { %v69_v0 = vlaneseq  ;;  %s889_s23 = sld [smem:[#allocation4]]  ;;  %v143_v1 = vld [vmem:[%s1368_s3] sm:$0xff]  ;;  %s894_s0 = sld [smem:[#allocation4 + $0x1]]  ;;  %v695_v5 = vld [vmem:[%s1368_s3 + $0x8] sm:$0xff]  ;;  %v696_v6 = vld [vmem:[%s1368_s3 + $0x10] sm:$0xff]  ;;  %v80_v7 = vstv %s1366_s1  ;;  %v855_v37 = vmov 0.0  }
  0x10   :  { %s896_s26 = sld [smem:[#allocation4 + $0x3]]  ;;  %v901_v2 = vld [vmem:[%s1369_s4] sm:$0xff]  ;;  %s903_s29 = sld [smem:[#allocation4 + $0x4]]  ;;  %v147_v8 = vand.u32 2147483647, %v143_v1  ;;  %v144_v11 = vmax.f32 %v143_v1, 0.0 }
  0x11   :  { %v70_v3 = vshrl.u32 %v69_v0, 7  ;;  %v72_v4 = vand.u32 127, %v69_v0  ;;  %s87_s13 = scvt.s32.f32 %s1367_s2  ;;  %v694_v9 = vmul.f32 -1.442695, %v143_v1  ;;  %s917_s14 = sld [smem:[#allocation4 + $0x2]]  ;;  %v145_v12 = vmul.f32 %v143_v1, %v901_v2  ;;  %v925_v13 = vld [vmem:[%s1368_s3 + $0x18] sm:$0xff] }
  0x12   :  { %s920_s15 = sld [smem:[#allocation4 + $0x5]]  ;;  %vm135_vm0 = vcmp.eq.f32.partialorder %v901_v2, 1.0  ;;  %v148_v14 = vsub.f32 0.0, %v147_v8  ;;  %v699_v15 = vmul.f32 -1.442695, %v695_v5  ;;  %vm139_vm1 = vcmp.eq.f32.partialorder %v901_v2, 0.0 }
  0x13   :  { %v73_v10 = vmul.u32 128, %v70_v3  ;;  %v700_v16 = vmul.f32 -1.442695, %v696_v6  ;;  %728 = vpow2.f32 %v694_v9  ;;  %v932_v18 = vld [vmem:[%s1368_s3 + $0x20] sm:$0xff]  ;;  %v181_v19 = vmul.f32 1.442695, %v925_v13 }
  0x14   :  { %v938_v20 = vld [vmem:[%s1369_s4 + $0x18] sm:$0xff]  ;;  %v943_v21 = vld [vmem:[%s1369_s4 + $0x20] sm:$0xff]  ;;  %v88_v22 = vstv %s87_s13  ;;  %v149_v23 = vmul.f32 1.442695, %v148_v14  ;;  %730 = vpow2.f32 %v699_v15  ;;  %s945_s22 = sld [smem:[#allocation4 + $0x6]]  ;;  %s947_s24 = sld [smem:[#allocation4 + $0x7]]  ;;  %v949_v25 = vsub.f32 %v144_v11, %v145_v12 }
  0x15   :  { %v74_v17 = vadd.s32 %v73_v10, %v72_v4  ;;  %732 = vpow2.f32 %v700_v16  ;;  %s951_s25 = sld [smem:[#allocation4 + $0x8]]  ;;  %v97_v26 = vstv %s889_s23  ;;  %v184_v28 = vmul.f32 1.442695, %v932_v18  ;;  %v965_v29 = vld [vmem:[%s1369_s4 + $0x8] sm:$0xff]  ;;  %s979_s7 = sld [smem:[#allocation4 + $0x9]]  ;;  %v988_v40 = vld [vmem:[%s1369_s4 + $0x10] sm:$0xff] }
  0x16   :  { %734 = vpow2.f32 %v149_v23  ;;  %v198_v30 = vmul.f32 0.5, %v938_v20  ;;  %v971_v31 = vld [vmem:[%s1369_s4 + $0x28] sm:$0xff]  ;;  %v101_v33 = vstv %s894_s0  ;;  %v108_v34 = vstv %s896_s26  ;;  %v1006_v45 = vld [vmem:[%s1368_s3 + $0x30] sm:$0xff]  ;;  %s1038_s17 = sld [smem:[#allocation4 + $0xa]]  ;;  %s1046_s18 = sld [smem:[#allocation4 + $0xb]] }
  0x17   :  { %vm78_vm2 = vcmp.lt.s32.totalorder %v74_v17, 1014  ;;  %v81_v24 = vadd.s32 %v80_v7, %v74_v17  ;;  %v208_v35 = vmul.f32 0.5, %v943_v21  ;;  %v111_v36 = vstv %s903_s29  ;;  %v1000_v44 = vld [vmem:[%s1368_s3 + $0x28] sm:$0xff]  ;;  %v1025_v53 = vld [vmem:[%s1368_s3 + $0x38] sm:$0xff]  ;;  %v1044_v62 = vld [vmem:[%s1368_s3 + $0x40] sm:$0xff] }
  0x18   :  { %vm957_vm3 = vmand %vm78_vm2, %vm139_vm1  ;;  %v105_v39 = vstv %s917_s14  ;;  %736 = vpow2.f32 %v181_v19  ;;  %v992_v42 = vsub.f32 %v965_v29, %v198_v30  ;;  %v995_v43 = vadd.f32 %v965_v29, %v198_v30  ;;  %v1057_v7 = vld [vmem:[%s1368_s3 + $0x48] sm:$0xff]  ;;  %v1066_v16 = vld [vmem:[%s1368_s3 + $0x50] sm:$0xff] }
  0x19   :  { %v82_v32 = vcvt.s32.f32 %v81_v24  ;;  %vm136_vm4 = vmand %vm78_vm2, %vm135_vm0  ;;  %vm253_vm5 = vcmp.eq.f32.partialorder %v971_v31, 0.0  ;;  %v1010_v46 = vsel %vm957_vm3, 1.0, %v855_v37  ;;  %v114_v47 = vstv %s920_s15  ;;  %v1073_v23 = vld [vmem:[%s1368_s3 + $0x58] sm:$0xff] }
  0x1a   :  { %v982_v38 = vsel %vm136_vm4, 1.0, %v855_v37  ;;  %738 = vpow2.f32 %v184_v28  ;;  %v254_v48 = vsel %vm253_vm5, %v1000_v44, 0.0  ;;  %v1015_v50 = vsub.f32 %v988_v40, %v208_v35  ;;  %v1080_v28 = vld [vmem:[%s1368_s3 + $0x60] sm:$0xff]  ;;  %v1088_v37 = vld [vmem:[%s1368_s3 + $0x68] sm:$0xff] }
  0x1b   :  { %v84_v41 = vmul.f32 0.00591716, %v82_v32  ;;  %592 = vadd.xlane.f32.xlu0 %v982_v38  ;;  %v1018_v51 = vadd.f32 %v988_v40, %v208_v35  ;;  %v219_v52 = vsub.f32 %v995_v43, %v992_v42  ;;  %v117_v54 = vstv %s945_s22 }
  0x1c   :  { %v120_v55 = vstv %s947_s24  ;;  %v257_v56 = vmax.f32 %v1000_v44, %v1006_v45  ;;  %vm258_vm6 = vcmp.eq.f32.partialorder %v971_v31, 1.0  ;;  %v123_v60 = vstv %s951_s25 }
  0x1d   :  { %v85_v49 = vfloor.f32 %v84_v41  ;;  %v1032_v57 = vpop.eup %728  ;;  %v220_v59 = vsub.f32 %v1018_v51, %v1015_v50  ;;  %v259_v61 = vsel %vm258_vm6, %v1006_v45, %v254_v48  ;;  %vm263_vm7 = vcmp.eq.f32.partialorder %v971_v31, 2.0 }
  0x1e   :  { %v731_v63 = vpop.eup %730  ;;  %v262_v0 = vmax.f32 %v257_v56, %v1025_v53  ;;  %vm268_vm8 = vcmp.eq.f32.partialorder %v971_v31, 3.0  ;;  %vm273_vm9 = vcmp.eq.f32.partialorder %v971_v31, 4.0  ;;  %v126_v5 = vstv %s979_s7  ;;  %v1097_v56 = vld [vmem:[%s1368_s3 + $0x70] sm:$0xff] }
  0x1f   :  { %v89_v58 = vadd.f32 %v88_v22, %v85_v49  ;;  %594 = vadd.xlane.f32.xlu0 %v1010_v46  ;;  %v733_v1 = vpop.eup %732  ;;  %v172_v4 = vadd.f32 1.0, %v731_v63  ;;  %v264_v6 = vsel %vm263_vm7, %v1025_v53, %v259_v61  ;;  %vm278_vm10 = vcmp.eq.f32.partialorder %v971_v31, 5.0 }
  0x20   :  { %v735_v8 = vpop.eup %734  ;;  %v178_v9 = vadd.f32 1.0, %v733_v1  ;;  %v267_v10 = vmax.f32 %v262_v0, %v1044_v62  ;;  %v269_v11 = vsel %vm268_vm8, %v1044_v62, %v264_v6  ;;  %vm283_vm11 = vcmp.eq.f32.partialorder %v971_v31, 6.0  ;;  %v1106_v0 = vld [vmem:[%s1368_s3 + $0x78] sm:$0xff] }
  0x21   :  { %v91_v3 = vmul.f32 0.33333334, %v89_v58  ;;  %v151_v14 = vadd.f32 1.0, %v735_v8  ;;  %740 = vrcp.f32 %v172_v4  ;;  %v274_v15 = vsel %vm273_vm9, %v1057_v7, %v269_v11 }
  0x22   :  { %v737_v17 = vpop.eup %736  ;;  %742 = vrcp.f32 %v178_v9  ;;  %v272_v19 = vmax.f32 %v267_v10, %v1057_v7  ;;  %v279_v22 = vsel %vm278_vm10, %v1066_v16, %v274_v15  ;;  %vm288_vm12 = vcmp.eq.f32.partialorder %v971_v31, 7.0 }
  0x23   :  { %v92_v12 = vfloor.f32 %v91_v3  ;;  %744 = vlog2.f32 %v151_v14  ;;  %v284_v27 = vsel %vm283_vm11, %v1073_v23, %v279_v22  ;;  %vm293_vm13 = vcmp.eq.f32.partialorder %v971_v31, 8.0 }
  0x24   :  { %v739_v30 = vpop.eup %738  ;;  %v277_v32 = vmax.f32 %v272_v19, %v1066_v16  ;;  %v289_v35 = vsel %vm288_vm12, %v1080_v28, %v284_v27  ;;  %vm298_vm14 = vcmp.eq.f32.partialorder %v971_v31, 9.0  ;;  %v129_v48 = vstv %s1038_s17 }
  0x25   :  { %v93_v24 = vmul.f32 3.0, %v92_v12  ;;  %v294_v49 = vsel %vm293_vm13, %v1088_v37, %v289_v35  ;;  %vm303_vm15 = vcmp.eq.f32.partialorder %v971_v31, 10.0  ;;  %v132_v61 = vstv %s1046_s18 }
  0x26   :  { %v282_v63 = vmax.f32 %v277_v32, %v1073_v23  ;;  %vm308_vm0 = vcmp.eq.f32.partialorder %v971_v31, 11.0  ;;  %vm313_vm4 = vcmp.eq.f32.partialorder %v971_v31, 12.0  ;;  %vm318_vm5 = vcmp.eq.f32.partialorder %v971_v31, 13.0 }
  0x27   :  { %v94_v41 = vsub.f32 %v89_v58, %v93_v24  ;;  %v299_v58 = vsel %vm298_vm14, %v1097_v56, %v294_v49  ;;  %vm323_vm6 = vcmp.eq.f32.partialorder %v971_v31, 14.0  ;;  %vm328_vm7 = vcmp.eq.f32.partialorder %v971_v31, 15.0 }
  0x28   :  { %v304_v1 = vsel %vm303_vm15, %v1106_v0, %v299_v58  ;;  %vm333_vm8 = vcmp.eq.f32.partialorder %v971_v31, 16.0  ;;  %vm338_vm9 = vcmp.eq.f32.partialorder %v971_v31, 17.0  ;;  %vm343_vm10 = vcmp.eq.f32.partialorder %v971_v31, 18.0 }
  0x29   :  { %vm95_vm1 = vcmp.eq.f32.partialorder %v94_v41, 0.0  ;;  %vm99_vm2 = vcmp.eq.f32.partialorder %v94_v41, 1.0  ;;  %vm103_vm3 = vcmp.eq.f32.partialorder %v94_v41, 2.0  ;;  %vm348_vm11 = vcmp.eq.f32.partialorder %v971_v31, 19.0 }
  0x2a   :  { %v98_v3 = vsel %vm95_vm1, %v97_v26, 0.0  ;;  %v109_v4 = vsel %vm95_vm1, %v108_v34, 0.0  ;;  %v118_v6 = vsel %vm95_vm1, %v117_v54, 0.0  ;;  %v127_v8 = vsel %vm95_vm1, %v126_v5, 0.0 }
  0x2b   :  { %v102_v9 = vsel %vm99_vm2, %v101_v33, %v98_v3  ;;  %v112_v10 = vsel %vm99_vm2, %v111_v36, %v109_v4  ;;  %v121_v11 = vsel %vm99_vm2, %v120_v55, %v118_v6  ;;  %v130_v12 = vsel %vm99_vm2, %v129_v48, %v127_v8  ;;  %v741_v26 = vpop.eup %740  ;;  %v1133_v33 = vld [vmem:[%s1368_s3 + $0x80] sm:$0xff] }
  0x2c   :  { %v106_v14 = vsel %vm103_vm3, %v105_v39, %v102_v9  ;;  %v115_v15 = vsel %vm103_vm3, %v114_v47, %v112_v10  ;;  %v124_v19 = vsel %vm103_vm3, %v123_v60, %v121_v11  ;;  %v133_v22 = vsel %vm103_vm3, %v132_v61, %v130_v12  ;;  %v743_v36 = vpop.eup %742 }
  0x2d   :  { %v183_v24 = vmul.f32 %v737_v17, %v106_v14  ;;  %v186_v34 = vmul.f32 %v739_v30, %v115_v15  ;;  %v230_v54 = vmul.f32 %v938_v20, %v124_v19  ;;  %v234_v5 = vmul.f32 %v943_v21, %v133_v22  ;;  %v745_v21 = vpop.eup %744  ;;  %v1180_v14 = vld [vmem:[%s1368_s3 + $0x98] sm:$0xff] }
  0x2e   :  { %v221_v39 = vmul.f32 %v220_v59, %v219_v52  ;;  %v287_v47 = vmax.f32 %v282_v63, %v1080_v28  ;;  %v309_v20 = vsel %vm308_vm0, %v1133_v33, %v304_v1  ;;  %v153_v27 = vmul.f32 0.6931472, %v745_v21 }
  0x2f   :  { %v195_v55 = vmul.f32 0.5, %v183_v24  ;;  %v205_v60 = vmul.f32 0.5, %v186_v34  ;;  %v231_v17 = vadd.f32 1e-16, %v230_v54  ;;  %v235_v30 = vadd.f32 1e-16, %v234_v5 }
  0x30   :  { %v238_v32 = vsub.f32 %v741_v26, %v965_v29  ;;  %v292_v52 = vmax.f32 %v287_v47, %v1088_v37  ;;  %v154_v49 = vadd.f32 %v153_v27, %v949_v25  ;;  %v240_v8 = vsub.f32 %v743_v36, %v988_v40  ;;  %v1171_v40 = vld [vmem:[%s1368_s3 + $0x90] sm:$0xff]  ;;  %v1197_v54 = vld [vmem:[%s1368_s3 + $0xa8] sm:$0xff] }
  0x31   :  { %v196_v59 = vsub.f32 %v741_v26, %v195_v55  ;;  %v197_v35 = vadd.f32 %v741_v26, %v195_v55  ;;  %v206_v41 = vsub.f32 %v743_v36, %v205_v60  ;;  %v207_v48 = vadd.f32 %v743_v36, %v205_v60  ;;  %v1190_v26 = vld [vmem:[%s1368_s3 + $0xa0] sm:$0xff]  ;;  %v1212_v60 = vld [vmem:[%s1368_s3 + $0xb8] sm:$0xff] }
  0x32   :  { %746 = vlog2.f32 %v231_v17  ;;  %v297_v61 = vmax.f32 %v292_v52, %v1097_v56  ;;  %v553_v3 = vmul.f32 %v1010_v46, %v154_v49  ;;  %v558_v25 = vmul.f32 %v982_v38, %v154_v49  ;;  %v1219_v52 = vld [vmem:[%s1368_s3 + $0xc0] sm:$0xff] }
  0x33   :  { %v201_v63 = vmin.f32 %v197_v35, %v995_v43  ;;  %v202_v58 = vmax.f32 %v196_v59, %v992_v42  ;;  %v211_v1 = vmin.f32 %v207_v48, %v1018_v51  ;;  %v212_v29 = vmax.f32 %v206_v41, %v1015_v50  ;;  %v1162_v43 = vld [vmem:[%s1368_s3 + $0x88] sm:$0xff] }
  0x34   :  { %v216_v4 = vsub.f32 %v197_v35, %v196_v59  ;;  %v217_v6 = vsub.f32 %v207_v48, %v206_v41  ;;  %748 = vlog2.f32 %v235_v30  ;;  %596 = vadd.xlane.f32.xlu1 %v553_v3  ;;  %v302_v50 = vmax.f32 %v297_v61, %v1106_v0 }
  0x35   :  { %v203_v9 = vsub.f32 %v201_v63, %v202_v58  ;;  %v213_v10 = vsub.f32 %v211_v1, %v212_v29  ;;  %v314_v46 = vsel %vm313_vm4, %v1162_v43, %v309_v20  ;;  %v239_v20 = vmul.f32 %v238_v32, %v238_v32 }
  0x36   :  { %v218_v42 = vmul.f32 %v217_v6, %v216_v4  ;;  %v319_v12 = vsel %vm318_vm5, %v1171_v40, %v314_v46  ;;  %v307_v19 = vmax.f32 %v302_v50, %v1133_v33  ;;  %v241_v21 = vmul.f32 %v240_v8, %v240_v8 }
  0x37   :  { %v204_v51 = vmax.f32 %v203_v9, 0.0  ;;  %v214_v11 = vmax.f32 %v213_v10, 0.0  ;;  %v324_v22 = vsel %vm323_vm6, %v1180_v14, %v319_v12  ;;  %v158_v31 = vadd.f32 1.0, %v1032_v57 }
  0x38   :  { %v222_v15 = vadd.f32 %v221_v39, %v218_v42  ;;  %v329_v34 = vsel %vm328_vm7, %v1190_v26, %v324_v22  ;;  %598 = vadd.xlane.f32.xlu1 %v558_v25  ;;  %v312_v5 = vmax.f32 %v307_v19, %v1162_v43  ;;  %v1205_v39 = vld [vmem:[%s1368_s3 + $0xb0] sm:$0xff]  ;;  %v242_v49 = vadd.f32 %v241_v21, %v239_v20 }
  0x39   :  { %v215_v24 = vmul.f32 %v214_v11, %v204_v51  ;;  %v334_v36 = vsel %vm333_vm8, %v1197_v54, %v329_v34  ;;  %vm656_vm12 = vcmask 0  }
  0x3a   :  { %v339_v55 = vsel %vm338_vm9, %v1205_v39, %v334_v36  ;;  %v317_v27 = vmax.f32 %v312_v5, %v1171_v40 }
  0x3b   :  { %v223_v47 = vsub.f32 %v222_v15, %v215_v24  ;;  %v344_v30 = vsel %vm343_vm10, %v1212_v60, %v339_v55 }
  0x3c   :  { %v747_v17 = vpop.eup %746  ;;  %v1223_v35 = vsel %vm348_vm11, %v1219_v52, %v344_v30  ;;  %v322_v41 = vmax.f32 %v317_v27, %v1180_v14 }
  0x3d   :  { %v224_v32 = vadd.f32 1e-06, %v223_v47  ;;  %v233_v59 = vmul.f32 0.6931472, %v747_v17 }
  0x3e   :  { %v749_v48 = vpop.eup %748  ;;  %v327_v58 = vmax.f32 %v322_v41, %v1190_v26 }
  0x3f   :  { %750 = vrcp.f32 %v224_v32  ;;  %v243_v61 = vsub.f32 %v925_v13, %v233_v59  ;;  %v237_v63 = vmul.f32 0.6931472, %v749_v48 }
  0x40   :  { %752 = vrcp.f32 %v158_v31  ;;  %v332_v57 = vmax.f32 %v327_v58, %v1197_v54 }
  0x41   :  { %v244_v1 = vmul.f32 %v243_v61, %v243_v61  ;;  %v246_v29 = vsub.f32 %v932_v18, %v237_v63 }
  0x42   :  { %v337_v6 = vmax.f32 %v332_v57, %v1205_v39 }
  0x43   :  { %v245_v3 = vadd.f32 %v244_v1, %v242_v49  ;;  %v247_v4 = vmul.f32 %v246_v29, %v246_v29 }
  0x44   :  { %v342_v25 = vmax.f32 %v337_v6, %v1212_v60 }
  0x45   :  { %v248_v8 = vadd.f32 %v247_v4, %v245_v3 }
  0x46   :  { %v1234_v13 = vmax.f32 %v342_v25, %v1219_v52 }
  0x47   :  { %v568_v9 = vmul.f32 %v982_v38, %v248_v8 }
  0x48   :  { %v357_v18 = vsub.f32 %v1000_v44, %v1234_v13  ;;  %v366_v50 = vsub.f32 %v1006_v45, %v1234_v13  ;;  %v375_v51 = vsub.f32 %v1025_v53, %v1234_v13  ;;  %v384_v11 = vsub.f32 %v1044_v62, %v1234_v13 }
  0x49   :  { %v751_v10 = vpop.eup %750  ;;  %602 = vadd.xlane.f32.xlu1 %v568_v9  ;;  %v393_v22 = vsub.f32 %v1057_v7, %v1234_v13  ;;  %v402_v45 = vsub.f32 %v1066_v16, %v1234_v13  ;;  %v411_v62 = vsub.f32 %v1073_v23, %v1234_v13  ;;  %v420_v7 = vsub.f32 %v1080_v28, %v1234_v13 }
  0x4a   :  { %v226_v42 = vmul.f32 %v751_v10, %v215_v24  ;;  %v753_v46 = vpop.eup %752  ;;  %v358_v15 = vmul.f32 1.442695, %v357_v18  ;;  %v367_v19 = vmul.f32 1.442695, %v366_v50  ;;  %v376_v24 = vmul.f32 1.442695, %v375_v51 }
  0x4b   :  { %v385_v44 = vmul.f32 1.442695, %v384_v11  ;;  %v394_v53 = vmul.f32 1.442695, %v393_v22  ;;  %v403_v36 = vmul.f32 1.442695, %v402_v45  ;;  %v429_v16 = vsub.f32 %v1088_v37, %v1234_v13 }
  0x4c   :  { %v227_v12 = vmul.f32 %v226_v42, %v901_v2  ;;  %754 = vpow2.f32 %v358_v15  ;;  %v412_v47 = vmul.f32 1.442695, %v411_v62  ;;  %v354_v20 = vmin.f32 %v1234_v13, 0.0 }
  0x4d   :  { %756 = vpow2.f32 %v367_v19  ;;  %v421_v21 = vmul.f32 1.442695, %v420_v7  ;;  %v438_v23 = vsub.f32 %v1097_v56, %v1234_v13  ;;  %v350_v55 = vmax.f32 %v1234_v13, 0.0 }
  0x4e   :  { %v228_v34 = vsub.f32 %v753_v46, %v227_v12  ;;  %758 = vpow2.f32 %v376_v24  ;;  %v430_v17 = vmul.f32 1.442695, %v429_v16  ;;  %v447_v28 = vsub.f32 %v1106_v0, %v1234_v13 }
  0x4f   :  { %760 = vpow2.f32 %v385_v44  ;;  %v355_v30 = vmul.f32 1.442695, %v354_v20  ;;  %v439_v32 = vmul.f32 1.442695, %v438_v23  ;;  %v456_v37 = vsub.f32 %v1133_v33, %v1234_v13 }
  0x50   :  { %v229_v5 = vmul.f32 %v228_v34, %v228_v34  ;;  %762 = vpow2.f32 %v394_v53  ;;  %v351_v56 = vsub.f32 0.0, %v350_v55  ;;  %v448_v49 = vmul.f32 1.442695, %v447_v28 }
  0x51   :  { %764 = vpow2.f32 %v403_v36  ;;  %v465_v61 = vsub.f32 %v1162_v43, %v1234_v13  ;;  %v457_v58 = vmul.f32 1.442695, %v456_v37  ;;  %v474_v1 = vsub.f32 %v1171_v40, %v1234_v13 }
  0x52   :  { %v563_v2 = vmul.f32 %v982_v38, %v229_v5  ;;  %766 = vpow2.f32 %v412_v47  ;;  %v352_v29 = vmul.f32 1.442695, %v351_v56  ;;  %v483_v4 = vsub.f32 %v1180_v14, %v1234_v13 }
  0x53   :  { %768 = vpow2.f32 %v421_v21  ;;  %v466_v3 = vmul.f32 1.442695, %v465_v61  ;;  %v475_v43 = vmul.f32 1.442695, %v474_v1  ;;  %v492_v25 = vsub.f32 %v1190_v26, %v1234_v13 }
  0x54   :  { %600 = vadd.xlane.f32.xlu0 %v563_v2  ;;  %770 = vpow2.f32 %v430_v17  ;;  %v484_v40 = vmul.f32 1.442695, %v483_v4  ;;  %v501_v42 = vsub.f32 %v1197_v54, %v1234_v13  ;;  %v510_v50 = vsub.f32 %v1205_v39, %v1234_v13 }
  0x55   :  { %772 = vpow2.f32 %v355_v30  ;;  %v519_v14 = vsub.f32 %v1212_v60, %v1234_v13  ;;  %v493_v51 = vmul.f32 1.442695, %v492_v25  ;;  %v528_v12 = vsub.f32 %v1219_v52, %v1234_v13 }
  0x56   :  { %v755_v27 = vpop.eup %754  ;;  %774 = vpow2.f32 %v439_v32  ;;  %v502_v19 = vmul.f32 1.442695, %v501_v42  ;;  %v511_v22 = vmul.f32 1.442695, %v510_v50 }
  0x57   :  { %v757_v31 = vpop.eup %756  ;;  %776 = vpow2.f32 %v448_v49  ;;  %v520_v24 = vmul.f32 1.442695, %v519_v14  ;;  %v529_v5 = vmul.f32 1.442695, %v528_v12 }
  0x58   :  { %v759_v59 = vpop.eup %758  ;;  %v369_v41 = vadd.f32 %v757_v31, %v755_v27  ;;  %778 = vpow2.f32 %v457_v58 }
  0x59   :  { %v761_v48 = vpop.eup %760  ;;  %780 = vpow2.f32 %v352_v29 }
  0x5a   :  { %v378_v0 = vadd.f32 %v759_v59, %v369_v41  ;;  %v763_v63 = vpop.eup %762  ;;  %782 = vpow2.f32 %v466_v3 }
  0x5b   :  { %v765_v57 = vpop.eup %764  ;;  %784 = vpow2.f32 %v475_v43 }
  0x5c   :  { %v387_v33 = vadd.f32 %v761_v48, %v378_v0  ;;  %v767_v8 = vpop.eup %766  ;;  %786 = vpow2.f32 %v484_v40 }
  0x5d   :  { %v769_v10 = vpop.eup %768  ;;  %788 = vpow2.f32 %v493_v51 }
  0x5e   :  { %v396_v6 = vadd.f32 %v763_v63, %v387_v33  ;;  %v771_v46 = vpop.eup %770  ;;  %790 = vpow2.f32 %v502_v19 }
  0x5f   :  { %v1280_v11 = vpop.eup %772  ;;  %792 = vpow2.f32 %v511_v22 }
  0x60   :  { %v405_v9 = vadd.f32 %v765_v57, %v396_v6  ;;  %v775_v15 = vpop.eup %774  ;;  %v361_v39 = vmul.f32 %v1280_v11, %v755_v27  ;;  %v370_v60 = vmul.f32 %v1280_v11, %v757_v31  ;;  %v379_v44 = vmul.f32 %v1280_v11, %v759_v59 }
  0x61   :  { %v777_v34 = vpop.eup %776  ;;  %v388_v53 = vmul.f32 %v1280_v11, %v761_v48  ;;  %v397_v52 = vmul.f32 %v1280_v11, %v763_v63  ;;  %v406_v7 = vmul.f32 %v1280_v11, %v765_v57  ;;  %794 = vpow2.f32 %v520_v24 }
  0x62   :  { %v414_v18 = vadd.f32 %v767_v8, %v405_v9  ;;  %v779_v62 = vpop.eup %778  ;;  %796 = vpow2.f32 %v529_v5  ;;  %v415_v28 = vmul.f32 %v1280_v11, %v767_v8  ;;  %v424_v37 = vmul.f32 %v1280_v11, %v769_v10 }
  0x63   :  { %v1289_v2 = vpop.eup %780  ;;  %v433_v48 = vmul.f32 %v1280_v11, %v771_v46  ;;  %v442_v63 = vmul.f32 %v775_v15, %v1280_v11  ;;  %v451_v57 = vmul.f32 %v777_v34, %v1280_v11  ;;  %v460_v4 = vmul.f32 %v779_v62, %v1280_v11 }
  0x64   :  { %v423_v26 = vadd.f32 %v769_v10, %v414_v18  ;;  %v783_v47 = vpop.eup %782  ;;  %v362_v16 = vadd.f32 %v1289_v2, %v361_v39  ;;  %v371_v20 = vadd.f32 %v1289_v2, %v370_v60  ;;  %v380_v21 = vadd.f32 %v1289_v2, %v379_v44 }
  0x65   :  { %v389_v17 = vadd.f32 %v1289_v2, %v388_v53  ;;  %v785_v27 = vpop.eup %784  ;;  %v398_v30 = vadd.f32 %v1289_v2, %v397_v52  ;;  %v407_v32 = vadd.f32 %v1289_v2, %v406_v7  ;;  %v416_v56 = vadd.f32 %v1289_v2, %v415_v28 }
  0x66   :  { %v432_v54 = vadd.f32 %v771_v46, %v423_v26  ;;  %798 = vlog2.f32 %v362_v16  ;;  %v787_v59 = vpop.eup %786  ;;  %v425_v0 = vadd.f32 %v1289_v2, %v424_v37  ;;  %v434_v29 = vadd.f32 %v1289_v2, %v433_v48 }
  0x67   :  { %800 = vlog2.f32 %v371_v20  ;;  %v789_v49 = vpop.eup %788  ;;  %v443_v43 = vadd.f32 %v1289_v2, %v442_v63  ;;  %v469_v9 = vmul.f32 %v783_v47, %v1280_v11  ;;  %v452_v18 = vadd.f32 %v1289_v2, %v451_v57 }
  0x68   :  { %v441_v45 = vadd.f32 %v775_v15, %v432_v54  ;;  %802 = vlog2.f32 %v380_v21  ;;  %v791_v58 = vpop.eup %790  ;;  %v461_v46 = vadd.f32 %v1289_v2, %v460_v4  ;;  %v478_v15 = vmul.f32 %v785_v27, %v1280_v11 }
  0x69   :  { %804 = vlog2.f32 %v389_v17  ;;  %v793_v1 = vpop.eup %792  ;;  %v470_v39 = vadd.f32 %v1289_v2, %v469_v9  ;;  %v487_v60 = vmul.f32 %v787_v59, %v1280_v11  ;;  %v505_v16 = vmul.f32 %v791_v58, %v1280_v11 }
  0x6a   :  { %v450_v36 = vadd.f32 %v777_v34, %v441_v45  ;;  %806 = vlog2.f32 %v398_v30  ;;  %v479_v53 = vadd.f32 %v1289_v2, %v478_v15  ;;  %v514_v28 = vmul.f32 %v793_v1, %v1280_v11 }
  0x6b   :  { %808 = vlog2.f32 %v407_v32  ;;  %v795_v3 = vpop.eup %794  ;;  %v506_v32 = vadd.f32 %v1289_v2, %v505_v16 }
  0x6c   :  { %v459_v23 = vadd.f32 %v779_v62, %v450_v36  ;;  %810 = vlog2.f32 %v416_v56  ;;  %v797_v6 = vpop.eup %796  ;;  %v496_v62 = vmul.f32 %v789_v49, %v1280_v11  ;;  %v523_v37 = vmul.f32 %v795_v3, %v1280_v11 }
  0x6d   :  { %812 = vlog2.f32 %v425_v0  ;;  %v515_v48 = vadd.f32 %v1289_v2, %v514_v28 }
  0x6e   :  { %v468_v31 = vadd.f32 %v783_v47, %v459_v23  ;;  %814 = vlog2.f32 %v434_v29  ;;  %v488_v47 = vadd.f32 %v1289_v2, %v487_v60  ;;  %v497_v17 = vadd.f32 %v1289_v2, %v496_v62 }
  0x6f   :  { %816 = vlog2.f32 %v443_v43  ;;  %v541_v62 = vmul.f32 20.0, %v350_v55 }
  0x70   :  { %v477_v41 = vadd.f32 %v785_v27, %v468_v31  ;;  %v799_v25 = vpop.eup %798  ;;  %818 = vlog2.f32 %v452_v18 }
  0x71   :  { %v801_v10 = vpop.eup %800  ;;  %v364_v42 = vmul.f32 0.6931472, %v799_v25  ;;  %820 = vlog2.f32 %v461_v46 }
  0x72   :  { %v486_v61 = vadd.f32 %v787_v59, %v477_v41  ;;  %v803_v50 = vpop.eup %802  ;;  %v373_v14 = vmul.f32 0.6931472, %v801_v10 }
  0x73   :  { %v805_v51 = vpop.eup %804  ;;  %v382_v12 = vmul.f32 0.6931472, %v803_v50 }
  0x74   :  { %v495_v33 = vadd.f32 %v789_v49, %v486_v61  ;;  %v807_v19 = vpop.eup %806  ;;  %v374_v54 = vadd.f32 %v373_v14, %v364_v42  ;;  %v391_v22 = vmul.f32 0.6931472, %v805_v51  ;;  %v532_v49 = vmul.f32 %v797_v6, %v1280_v11 }
  0x75   :  { %v809_v24 = vpop.eup %808  ;;  %v400_v45 = vmul.f32 0.6931472, %v807_v19 }
  0x76   :  { %v504_v8 = vadd.f32 %v791_v58, %v495_v33  ;;  %v383_v44 = vadd.f32 %v382_v12, %v374_v54  ;;  %v811_v5 = vpop.eup %810  ;;  %v409_v36 = vmul.f32 0.6931472, %v809_v24 }
  0x77   :  { %v813_v7 = vpop.eup %812  ;;  %v418_v21 = vmul.f32 0.6931472, %v811_v5 }
  0x78   :  { %v513_v40 = vadd.f32 %v793_v1, %v504_v8  ;;  %v392_v52 = vadd.f32 %v391_v22, %v383_v44  ;;  %v815_v23 = vpop.eup %814  ;;  %v427_v30 = vmul.f32 0.6931472, %v813_v7  ;;  %v524_v1 = vadd.f32 %v1289_v2, %v523_v37 }
  0x79   :  { %v817_v31 = vpop.eup %816  ;;  %v436_v41 = vmul.f32 0.6931472, %v815_v23 }
  0x7a   :  { %v522_v26 = vadd.f32 %v795_v3, %v513_v40  ;;  %v401_v20 = vadd.f32 %v400_v45, %v392_v52  ;;  %v819_v56 = vpop.eup %818  ;;  %v445_v63 = vmul.f32 0.6931472, %v817_v31  ;;  %v533_v3 = vadd.f32 %v1289_v2, %v532_v49 }
  0x7b   :  { %v821_v61 = vpop.eup %820  ;;  %v454_v57 = vmul.f32 0.6931472, %v819_v56 }
  0x7c   :  { %v531_v34 = vadd.f32 %v797_v6, %v522_v26  ;;  %v410_v27 = vadd.f32 %v409_v36, %v401_v20  ;;  %v463_v25 = vmul.f32 0.6931472, %v821_v61 }
  0x7e   :  { %822 = vlog2.f32 %v531_v34  ;;  %v419_v59 = vadd.f32 %v418_v21, %v410_v27 }
  0x7f   :  { %824 = vlog2.f32 %v470_v39 }
  0x80   :  { %826 = vlog2.f32 %v479_v53  ;;  %v428_v0 = vadd.f32 %v427_v30, %v419_v59 }
  0x81   :  { %828 = vlog2.f32 %v488_v47 }
  0x82   :  { %830 = vlog2.f32 %v497_v17  ;;  %v437_v29 = vadd.f32 %v436_v41, %v428_v0 }
  0x83   :  { %832 = vlog2.f32 %v506_v32 }
  0x84   :  { %834 = vlog2.f32 %v515_v48  ;;  %v446_v43 = vadd.f32 %v445_v63, %v437_v29 }
  0x85   :  { %836 = vlog2.f32 %v524_v1 }
  0x86   :  { %v455_v6 = vadd.f32 %v454_v57, %v446_v43  ;;  %838 = vlog2.f32 %v533_v3 }
  0x88   :  { %v823_v58 = vpop.eup %822  ;;  %v464_v18 = vadd.f32 %v463_v25, %v455_v6 }
  0x89   :  { %v538_v33 = vmul.f32 0.6931472, %v823_v58  ;;  %v825_v4 = vpop.eup %824 }
  0x8a   :  { %v827_v9 = vpop.eup %826  ;;  %v472_v10 = vmul.f32 0.6931472, %v825_v4 }
  0x8b   :  { %v539_v8 = vadd.f32 %v538_v33, %v1234_v13  ;;  %v829_v40 = vpop.eup %828  ;;  %v481_v50 = vmul.f32 0.6931472, %v827_v9 }
  0x8c   :  { %v831_v14 = vpop.eup %830  ;;  %v473_v46 = vadd.f32 %v472_v10, %v464_v18  ;;  %v490_v2 = vmul.f32 0.6931472, %v829_v40 }
  0x8d   :  { %v540_v11 = vsub.f32 %v539_v8, %v1223_v35  ;;  %v833_v51 = vpop.eup %832  ;;  %v499_v12 = vmul.f32 0.6931472, %v831_v14 }
  0x8e   :  { %v482_v26 = vadd.f32 %v481_v50, %v473_v46  ;;  %v835_v15 = vpop.eup %834  ;;  %v508_v54 = vmul.f32 0.6931472, %v833_v51 }
  0x8f   :  { %v573_v42 = vmul.f32 %v982_v38, %v540_v11  ;;  %v837_v22 = vpop.eup %836  ;;  %v517_v34 = vmul.f32 0.6931472, %v835_v15 }
  0x90   :  { %v491_v19 = vadd.f32 %v490_v2, %v482_v26  ;;  %v839_v39 = vpop.eup %838  ;;  %v526_v44 = vmul.f32 0.6931472, %v837_v22 }
  0x91   :  { %604 = vadd.xlane.f32.xlu0 %v573_v42  ;;  %v535_v5 = vmul.f32 0.6931472, %v839_v39 }
  0x92   :  { %v500_v24 = vadd.f32 %v499_v12, %v491_v19 }
  0x94   :  { %v509_v60 = vadd.f32 %v508_v54, %v500_v24 }
  0x96   :  { %v518_v45 = vadd.f32 %v517_v34, %v509_v60 }
  0x98   :  { %v527_v53 = vadd.f32 %v526_v44, %v518_v45 }
  0x9a   :  { %v536_v52 = vadd.f32 %v535_v5, %v527_v53 }
  0x9c   :  { %v542_v36 = vadd.f32 %v541_v62, %v536_v52 }
  0x9e   :  { %v543_v7 = vsub.f32 %v542_v36, %v1223_v35 }
  0xa0   :  { %v578_v47 = vmul.f32 %v982_v38, %v543_v7 }
  0xa2   :  { %606 = vadd.xlane.f32.xlu1 %v578_v47 }
  0xa8   :  { %v593_v16 = vpop.xlane.xlu0 %592 }
  0xa9   :  { %v608_v20 = vrot.slane %v593_v16, 4 }
  0xab   :  { %v609_v21 = vadd.f32 %v608_v20, %v593_v16 }
  0xac   :  { %v595_v23 = vpop.xlane.xlu0 %594 }
  0xad   :  { %v610_v17 = vrot.slane %v609_v21, 2  ;;  %v614_v28 = vrot.slane %v595_v23, 4 }
  0xaf   :  { %v611_v27 = vadd.f32 %v610_v17, %v609_v21  ;;  %v615_v30 = vadd.f32 %v614_v28, %v595_v23 }
  0xb1   :  { %v612_v31 = vrot.slane %v611_v27, 1  ;;  %v616_v32 = vrot.slane %v615_v30, 2 }
  0xb3   :  { %v613_v13 = vadd.f32 %v612_v31, %v611_v27  ;;  %v617_v55 = vadd.f32 %v616_v32, %v615_v30 }
  0xb5   :  { %657 = vst.msk [vmem:[%s1370_s5] sm:$0x1] %vm656_vm12, %v613_v13  ;;  %v618_v38 = vrot.slane %v617_v55, 1 }
  0xb7   :  { %v619_v35 = vadd.f32 %v618_v38, %v617_v55 }
  0xb9   :  { %658 = vst.msk [vmem:[%s1370_s5 + $0x1] sm:$0x1] %vm656_vm12, %v619_v35 }
  0xc1   :  { %v597_v37 = vpop.xlane.xlu1 %596 }
  0xc2   :  { %v620_v59 = vrot.slane %v597_v37, 4 }
  0xc4   :  { %v621_v41 = vadd.f32 %v620_v59, %v597_v37 }
  0xc5   :  { %v599_v56 = vpop.xlane.xlu1 %598 }
  0xc6   :  { %v622_v48 = vrot.slane %v621_v41, 2  ;;  %v626_v49 = vrot.slane %v599_v56, 4 }
  0xc8   :  { %v623_v61 = vadd.f32 %v622_v48, %v621_v41  ;;  %v627_v0 = vadd.f32 %v626_v49, %v599_v56 }
  0xca   :  { %v624_v63 = vrot.slane %v623_v61, 1  ;;  %v628_v58 = vrot.slane %v627_v0, 2 }
  0xcc   :  { %v625_v1 = vadd.f32 %v624_v63, %v623_v61  ;;  %v629_v33 = vadd.f32 %v628_v58, %v627_v0 }
  0xce   :  { %659 = vst.msk [vmem:[%s1370_s5 + $0x2] sm:$0x1] %vm656_vm12, %v625_v1  ;;  %v630_v29 = vrot.slane %v629_v33, 1 }
  0xd0   :  { %v631_v57 = vadd.f32 %v630_v29, %v629_v33 }
  0xd2   :  { %660 = vst.msk [vmem:[%s1370_s5 + $0x3] sm:$0x1] %vm656_vm12, %v631_v57 }
  0xd6   :  { %v603_v4 = vpop.xlane.xlu1 %602 }
  0xd7   :  { %v638_v3 = vrot.slane %v603_v4, 4 }
  0xd9   :  { %v639_v8 = vadd.f32 %v638_v3, %v603_v4 }
  0xdb   :  { %v640_v43 = vrot.slane %v639_v8, 2 }
  0xdd   :  { %v641_v25 = vadd.f32 %v640_v43, %v639_v8 }
  0xdf   :  { %v642_v9 = vrot.slane %v641_v25, 1 }
  0xe1   :  { %v601_v11 = vpop.xlane.xlu0 %600  ;;  %v643_v10 = vadd.f32 %v642_v9, %v641_v25 }
  0xe2   :  { %v632_v6 = vrot.slane %v601_v11, 4 }
  0xe3   :  { %662 = vst.msk [vmem:[%s1370_s5 + $0x5] sm:$0x1] %vm656_vm12, %v643_v10 }
  0xe4   :  { %v633_v40 = vadd.f32 %v632_v6, %v601_v11 }
  0xe6   :  { %v634_v42 = vrot.slane %v633_v40, 2 }
  0xe8   :  { %v635_v18 = vadd.f32 %v634_v42, %v633_v40 }
  0xea   :  { %v636_v50 = vrot.slane %v635_v18, 1 }
  0xec   :  { %v637_v14 = vadd.f32 %v636_v50, %v635_v18 }
  0xee   :  { %661 = vst.msk [vmem:[%s1370_s5 + $0x4] sm:$0x1] %vm656_vm12, %v637_v14 }
 0x11e   :  { %v605_v46 = vpop.xlane.xlu0 %604 }
 0x11f   :  { %v644_v2 = vrot.slane %v605_v46, 4 }
 0x121   :  { %v645_v51 = vadd.f32 %v644_v2, %v605_v46 }
 0x123   :  { %v646_v26 = vrot.slane %v645_v51, 2 }
 0x125   :  { %v647_v12 = vadd.f32 %v646_v26, %v645_v51 }
 0x127   :  { %v648_v15 = vrot.slane %v647_v12, 1 }
 0x129   :  { %v649_v19 = vadd.f32 %v648_v15, %v647_v12 }
 0x12b   :  { %663 = vst.msk [vmem:[%s1370_s5 + $0x6] sm:$0x1] %vm656_vm12, %v649_v19 }
 0x12f   :  { %v607_v54 = vpop.xlane.xlu1 %606 }
 0x130   :  { %v650_v22 = vrot.slane %v607_v54, 4 }
 0x132   :  { %v651_v24 = vadd.f32 %v650_v22, %v607_v54 }
 0x134   :  { %v652_v34 = vrot.slane %v651_v24, 2 }
 0x136   :  { %v653_v39 = vadd.f32 %v652_v34, %v651_v24 }
 0x138   :  { %v654_v60 = vrot.slane %v653_v39, 1 }
 0x13a   :  { %v655_v44 = vadd.f32 %v654_v60, %v653_v39 }
 0x13c   :  { %664 = vst.msk [vmem:[%s1370_s5 + $0x7] sm:$0x1] %vm656_vm12, %v655_v44 }

</bundles_post_ra>
